<compile_context>
chip_gen: v7x
topology: tpu7x:2x2x1
jax: 0.10.0
libtpu: 0.0.40
codegen_flags: <defaults>
</compile_context>

<pallas_src>
import math
from functools import partial

import jax
import jax.numpy as jnp
from jax.experimental import pallas as pl
from jax.experimental.pallas import tpu as pltpu  # noqa: F401  (kept for future grid/CompilerParams use)


# -----------------------------------------------------------------------------
# Fused kernel: positional encoding + all encoder blocks, single invocation
# -----------------------------------------------------------------------------
def _encoder_kernel(x_ref, pos_ref,
                    wqkv_ref, wo_ref,
                    g1_ref, be1_ref,
                    w1_ref, bf1_ref, w2_ref, bf2_ref,
                    g2_ref, be2_ref,
                    o_ref, *, batch, seq, num_heads, emb_scale):
    BS, H = x_ref.shape                      # (B*S, H)
    hd = H // num_heads
    num_layers = wqkv_ref.shape[0]

    # --- embedding scale + positional encoding (dropout = identity) ----------
    # pos_ref is (S, H); broadcast over the batch dim in-kernel.
    x = (x_ref[...].reshape(batch, seq, H) * emb_scale
         + pos_ref[...]).reshape(BS, H)                               # (BS, H) f32

    for l in range(num_layers):              # static unroll over layers
        # TODO(synk): at real sizes make layers a grid=(L,) "arbitrary" axis
        # (per-layer weight BlockSpecs, activation carried in VMEM scratch) so
        # only ~2 layers of weights are resident — mandatory on v7x (64 MiB).
        wqkv = wqkv_ref[l]                   # (H, 3H) bf16; 1/sqrt(hd) folded into Q
        wo = wo_ref[l]                       # (H, H)  bf16
        g1, b1 = g1_ref[l], be1_ref[l]       # (1, H)  f32
        w1, bf1 = w1_ref[l], bf1_ref[l]      # (H, F) bf16, (1, F) f32
        w2, bf2 = w2_ref[l], bf2_ref[l]      # (F, H) bf16, (1, H) f32
        g2, b2 = g2_ref[l], be2_ref[l]       # (1, H)  f32

        # --- multi-head self-attention: fused QKV projection ------------------
        xb = x.astype(jnp.bfloat16)
        qkv = jnp.dot(xb, wqkv, preferred_element_type=jnp.float32)  # (BS, 3H) f32
        qkv_b = qkv.astype(jnp.bfloat16)

        # TODO(synk): the per-head loop uses proven single-batch-dim 3-D
        # einsums; the fully head-batched ('bqhd,bkhd->bhqk') form needs a
        # multi-batch-dim dot_general / 4-D head transpose that Mosaic does
        # not lower reliably at these shapes.  At scale, fold heads into the
        # grid and tile attention flash-style instead.
        ctx_heads = []
        for h in range(num_heads):           # static unroll over heads
            qh = qkv_b[:, h * hd:(h + 1) * hd].reshape(batch, seq, hd)
            kh = qkv_b[:, H + h * hd:H + (h + 1) * hd].reshape(batch, seq, hd)
            vh = qkv_b[:, 2 * H + h * hd:2 * H + (h + 1) * hd].reshape(batch, seq, hd)
            # scores = (q * 1/sqrt(hd)) @ k^T, batched over batch dim
            s = jnp.einsum('bqd,bkd->bqk', qh, kh,
                           preferred_element_type=jnp.float32)        # (B, S, S)
            s = s - jnp.max(s, axis=-1, keepdims=True)
            p = jnp.exp(s)
            inv_denom = pl.reciprocal(jnp.sum(p, axis=-1, keepdims=True),
                                      approx=True)
            attn = (p * inv_denom).astype(jnp.bfloat16)
            ctx = jnp.einsum('bqk,bkd->bqd', attn, vh,
                             preferred_element_type=jnp.float32)      # (B, S, hd)
            ctx_heads.append(ctx.reshape(BS, hd))

        # single output projection over all heads (one K=H matmul)
        ctx_all = jnp.concatenate(ctx_heads, axis=-1).astype(jnp.bfloat16)  # (BS, H)
        attn_out = jnp.dot(ctx_all, wo, preferred_element_type=jnp.float32)

        # --- AddNorm 1 (dropout identity), one-pass variance -------------------
        y = x + attn_out
        mu = jnp.mean(y, axis=-1, keepdims=True)
        var = jnp.mean(y * y, axis=-1, keepdims=True) - mu * mu
        y = (y - mu) * jax.lax.rsqrt(var + 1e-5) * g1 + b1

        # --- Position-wise FFN --------------------------------------------------
        h1 = jnp.dot(y.astype(jnp.bfloat16), w1,
                     preferred_element_type=jnp.float32) + bf1
        h1 = jnp.maximum(h1, 0.0)
        ffn = jnp.dot(h1.astype(jnp.bfloat16), w2,
                      preferred_element_type=jnp.float32) + bf2

        # --- AddNorm 2, one-pass variance ---------------------------------------
        z = y + ffn
        mu2 = jnp.mean(z, axis=-1, keepdims=True)
        var2 = jnp.mean(z * z, axis=-1, keepdims=True) - mu2 * mu2
        x = (z - mu2) * jax.lax.rsqrt(var2 + 1e-5) * g2 + b2

    # TODO(synk): at real sizes pad H/F to multiples of 128 lanes (lane-dense
    # output) and add a >=2-wide "parallel" grid axis over B*S row tiles so
    # both v7x TensorCores are used.
    o_ref[...] = x.astype(o_ref.dtype)


# -----------------------------------------------------------------------------
# Parameter packing for the kernel (layer-stacked, QKV fused, bf16 weights)
# -----------------------------------------------------------------------------
def _pack_for_kernel(params, num_heads):
    blocks = params["blocks"]
    H = blocks[0]["wq"].shape[0]
    hd = H // num_heads
    q_scale = 1.0 / math.sqrt(hd)            # fold attention scale into W_q
    # Matmul operands -> bf16 (native MXU input); biases / LN params stay f32.
    wqkv = jnp.stack([jnp.concatenate([b["wq"] * q_scale, b["wk"], b["wv"]],
                                      axis=1) for b in blocks]
                     ).astype(jnp.bfloat16)                            # (L, H, 3H)
    wo = jnp.stack([b["wo"] for b in blocks]).astype(jnp.bfloat16)     # (L, H, H)
    g1 = jnp.stack([b["ln1_g"] for b in blocks])                       # (L, 1, H)
    be1 = jnp.stack([b["ln1_b"] for b in blocks])
    w1 = jnp.stack([b["w1"] for b in blocks]).astype(jnp.bfloat16)     # (L, H, F)
    bf1 = jnp.stack([b["b1"] for b in blocks])                         # (L, 1, F)
    w2 = jnp.stack([b["w2"] for b in blocks]).astype(jnp.bfloat16)     # (L, F, H)
    bf2 = jnp.stack([b["b2"] for b in blocks])                         # (L, 1, H)
    g2 = jnp.stack([b["ln2_g"] for b in blocks])
    be2 = jnp.stack([b["ln2_b"] for b in blocks])
    return (wqkv, wo, g1, be1, w1, bf1, w2, bf2, g2, be2)


# -----------------------------------------------------------------------------
# Wrapper
# -----------------------------------------------------------------------------
def transformer_encoder(tokens, params, *, num_hiddens, num_heads):
    B, S = tokens.shape
    H = num_hiddens
    # TODO(synk): embedding lookup (gather) stays in plain JAX (jnp.take); an
    # in-kernel DMA gather is not worthwhile at these sizes.
    x_emb = jnp.take(params["embedding"], tokens.reshape(-1), axis=0)   # (B*S, H)
    pos = params["pos_table"][0, :S, :]                                  # (S, H)
    packed = _pack_for_kernel(params, num_heads)

    out2d = pl.pallas_call(
        partial(_encoder_kernel, batch=B, seq=S, num_heads=num_heads,
                emb_scale=math.sqrt(float(H))),
        out_shape=jax.ShapeDtypeStruct((B * S, H), jnp.float32),
    )(x_emb, pos, *packed)
    return out2d.reshape(B, S, H)


# -----------------------------------------------------------------------------
# Pure-JAX reference (f32, exact softmax) for tolerance checking
# -----------------------------------------------------------------------------
def _layer_norm(x, g, b):
    mu = jnp.mean(x, axis=-1, keepdims=True)
    var = jnp.mean((x - mu) ** 2, axis=-1, keepdims=True)
    return (x - mu) * jax.lax.rsqrt(var + 1e-5) * g + b


def _reference_forward(tokens, params, *, num_hiddens, num_heads):
    B, S = tokens.shape
    H = num_hiddens
    hd = H // num_heads
    x = jnp.take(params["embedding"], tokens, axis=0) * math.sqrt(float(H))
    x = x + params["pos_table"][:, :S, :]
    for blk in params["blocks"]:
        q, k, v = x @ blk["wq"], x @ blk["wk"], x @ blk["wv"]

        def split(t):
            return t.reshape(B, S, num_heads, hd).transpose(0, 2, 1, 3)

        qh, kh, vh = split(q), split(k), split(v)
        s = jnp.einsum('bhqd,bhkd->bhqk', qh, kh) / math.sqrt(hd)
        a = jax.nn.softmax(s, axis=-1)
        ctx = jnp.einsum('bhqk,bhkd->bhqd', a, vh).transpose(0, 2, 1, 3)
        attn_out = ctx.reshape(B, S, H) @ blk["wo"]
        y = _layer_norm(x + attn_out, blk["ln1_g"][0], blk["ln1_b"][0])
        ffn = jnp.maximum(y @ blk["w1"] + blk["b1"][0], 0.0) @ blk["w2"] + blk["b2"][0]
        x = _layer_norm(y + ffn, blk["ln2_g"][0], blk["ln2_b"][0])
    return x


# -----------------------------------------------------------------------------
# Deterministic parameter construction
# -----------------------------------------------------------------------------
def make_params(key, vocab_size, num_hiddens, ffn_num_hiddens, num_layers, max_len):
    keys = jax.random.split(key, 1 + num_layers)
    params = {}
    params["embedding"] = (jax.random.normal(keys[0], (vocab_size, num_hiddens),
                                             jnp.float32) * 0.1)

    # Positional encoding table (1, max_len, H): even cols = sin, odd cols = cos.
    pos = jnp.arange(max_len, dtype=jnp.float32)[:, None]
    div = jnp.power(10000.0,
                    jnp.arange(0, num_hiddens, 2, dtype=jnp.float32) / num_hiddens)
    angles = pos / div                                           # (max_len, H/2)
    P = jnp.zeros((max_len, num_hiddens), jnp.float32)
    P = P.at[:, 0::2].set(jnp.sin(angles))
    P = P.at[:, 1::2].set(jnp.cos(angles))
    params["pos_table"] = P[None]                                # (1, max_len, H)

    blocks = []
    for i in range(num_layers):
        ks = jax.random.split(keys[1 + i], 6)
        s_attn = 1.0 / math.sqrt(num_hiddens)
        s_ffn1 = 1.0 / math.sqrt(num_hiddens)
        s_ffn2 = 1.0 / math.sqrt(ffn_num_hiddens)
        blk = {
            # MHA projections (use_bias=False)
            "wq": jax.random.normal(ks[0], (num_hiddens, num_hiddens), jnp.float32) * s_attn,
            "wk": jax.random.normal(ks[1], (num_hiddens, num_hiddens), jnp.float32) * s_attn,
            "wv": jax.random.normal(ks[2], (num_hiddens, num_hiddens), jnp.float32) * s_attn,
            "wo": jax.random.normal(ks[3], (num_hiddens, num_hiddens), jnp.float32) * s_attn,
            # LayerNorm 1 (PyTorch default init: gamma=1, beta=0)
            "ln1_g": jnp.ones((1, num_hiddens), jnp.float32),
            "ln1_b": jnp.zeros((1, num_hiddens), jnp.float32),
            # FFN (bias=True)
            "w1": jax.random.normal(ks[4], (num_hiddens, ffn_num_hiddens), jnp.float32) * s_ffn1,
            "b1": jnp.zeros((1, ffn_num_hiddens), jnp.float32),
            "w2": jax.random.normal(ks[5], (ffn_num_hiddens, num_hiddens), jnp.float32) * s_ffn2,
            "b2": jnp.zeros((1, num_hiddens), jnp.float32),
            # LayerNorm 2
            "ln2_g": jnp.ones((1, num_hiddens), jnp.float32),
            "ln2_b": jnp.zeros((1, num_hiddens), jnp.float32),
        }
        blocks.append(blk)
    params["blocks"] = blocks
    return params


# -----------------------------------------------------------------------------
# Main
# -----------------------------------------------------------------------------
if __name__ == "__main__":
    # Hyperparameters (small, consistent with the module's forward)
    vocab_size = 100
    num_hiddens = 32        # = key_size = query_size = value_size = ffn_num_input
    ffn_num_hiddens = 64
    num_heads = 4
    num_layers = 2
    dropout = 0.0           # eval mode -> dropout is identity
    batch_size, seq_len = 2, 8

    key = jax.random.PRNGKey(0)
    k_tok, k_par = jax.random.split(key)
    tokens = jax.random.randint(k_tok, (batch_size, seq_len), 0, vocab_size,
                                dtype=jnp.int32)
    params = make_params(k_par, vocab_size, num_hiddens, ffn_num_hiddens,
                         num_layers, max_len=seq_len)

    out = transformer_encoder(tokens, params,
                              num_hiddens=num_hiddens, num_heads=num_heads)
    out = jax.block_until_ready(out)
    assert out.shape == (batch_size, seq_len, num_hiddens)
    assert bool(jnp.all(jnp.isfinite(out)))

    # Tolerance check vs pure-JAX f32 reference.  The kernel feeds the MXU
    # bf16 operands (with f32 accumulation) and uses the approximate EUP
    # reciprocal in softmax, so tolerances are set accordingly.
    ref = jax.block_until_ready(
        _reference_forward(tokens, params, num_hiddens=num_hiddens,
                           num_heads=num_heads))
    assert bool(jnp.allclose(out, ref, atol=1e-1, rtol=1e-1)), \
        float(jnp.max(jnp.abs(out - ref)))

    print("KERNEL_OK")
</pallas_src>

<mosaic_0001>
module attributes {stable_mosaic.version = 11 : i64} {
  func.func @_encoder_kernel(%arg0: memref<16x32xf32, #tpu.memory_space<vmem>>, %arg1: memref<8x32xf32, #tpu.memory_space<vmem>>, %arg2: memref<2x32x96xbf16, #tpu.memory_space<vmem>>, %arg3: memref<2x32x32xbf16, #tpu.memory_space<vmem>>, %arg4: memref<2x1x32xf32, #tpu.memory_space<vmem>>, %arg5: memref<2x1x32xf32, #tpu.memory_space<vmem>>, %arg6: memref<2x32x64xbf16, #tpu.memory_space<vmem>>, %arg7: memref<2x1x64xf32, #tpu.memory_space<vmem>>, %arg8: memref<2x64x32xbf16, #tpu.memory_space<vmem>>, %arg9: memref<2x1x32xf32, #tpu.memory_space<vmem>>, %arg10: memref<2x1x32xf32, #tpu.memory_space<vmem>>, %arg11: memref<2x1x32xf32, #tpu.memory_space<vmem>>, %arg12: memref<16x32xf32, #tpu.memory_space<vmem>>) attributes {dimension_semantics = [], scalar_prefetch = 0 : i64, scratch_operands = 0 : i64, tpu.core_type = #tpu.core_type<tc>} {
    %c0 = arith.constant 0 : index
    %c0_0 = arith.constant 0 : index
    %0 = vector.load %arg0[%c0, %c0_0] : memref<16x32xf32, #tpu.memory_space<vmem>>, vector<16x32xf32>
    %1 = vector.shape_cast %0 : vector<16x32xf32> to vector<2x8x32xf32>
    %cst = arith.constant 5.65685415 : f32
    %2 = vector.broadcast %cst : f32 to vector<2x8x32xf32>
    %3 = arith.mulf %1, %2 : vector<2x8x32xf32>
    %c0_1 = arith.constant 0 : index
    %c0_2 = arith.constant 0 : index
    %4 = vector.load %arg1[%c0_1, %c0_2] : memref<8x32xf32, #tpu.memory_space<vmem>>, vector<8x32xf32>
    %5 = vector.shape_cast %4 : vector<8x32xf32> to vector<1x8x32xf32>
    %6 = vector.broadcast %5 : vector<1x8x32xf32> to vector<2x8x32xf32>
    %7 = arith.addf %3, %6 : vector<2x8x32xf32>
    %8 = vector.shape_cast %7 : vector<2x8x32xf32> to vector<16x32xf32>
    %c0_3 = arith.constant 0 : index
    %c0_4 = arith.constant 0 : index
    %c0_5 = arith.constant 0 : index
    %9 = vector.load %arg2[%c0_3, %c0_4, %c0_5] : memref<2x32x96xbf16, #tpu.memory_space<vmem>>, vector<1x32x96xbf16>
    %10 = vector.shape_cast %9 : vector<1x32x96xbf16> to vector<32x96xbf16>
    %c0_6 = arith.constant 0 : index
    %c0_7 = arith.constant 0 : index
    %c0_8 = arith.constant 0 : index
    %11 = vector.load %arg3[%c0_6, %c0_7, %c0_8] : memref<2x32x32xbf16, #tpu.memory_space<vmem>>, vector<1x32x32xbf16>
    %12 = vector.shape_cast %11 : vector<1x32x32xbf16> to vector<32x32xbf16>
    %c0_9 = arith.constant 0 : index
    %c0_10 = arith.constant 0 : index
    %c0_11 = arith.constant 0 : index
    %13 = vector.load %arg4[%c0_9, %c0_10, %c0_11] : memref<2x1x32xf32, #tpu.memory_space<vmem>>, vector<1x1x32xf32>
    %14 = vector.shape_cast %13 : vector<1x1x32xf32> to vector<1x32xf32>
    %c0_12 = arith.constant 0 : index
    %c0_13 = arith.constant 0 : index
    %c0_14 = arith.constant 0 : index
    %15 = vector.load %arg5[%c0_12, %c0_13, %c0_14] : memref<2x1x32xf32, #tpu.memory_space<vmem>>, vector<1x1x32xf32>
    %16 = vector.shape_cast %15 : vector<1x1x32xf32> to vector<1x32xf32>
    %c0_15 = arith.constant 0 : index
    %c0_16 = arith.constant 0 : index
    %c0_17 = arith.constant 0 : index
    %17 = vector.load %arg6[%c0_15, %c0_16, %c0_17] : memref<2x32x64xbf16, #tpu.memory_space<vmem>>, vector<1x32x64xbf16>
    %18 = vector.shape_cast %17 : vector<1x32x64xbf16> to vector<32x64xbf16>
    %c0_18 = arith.constant 0 : index
    %c0_19 = arith.constant 0 : index
    %c0_20 = arith.constant 0 : index
    %19 = vector.load %arg7[%c0_18, %c0_19, %c0_20] : memref<2x1x64xf32, #tpu.memory_space<vmem>>, vector<1x1x64xf32>
    %20 = vector.shape_cast %19 : vector<1x1x64xf32> to vector<1x64xf32>
    %c0_21 = arith.constant 0 : index
    %c0_22 = arith.constant 0 : index
    %c0_23 = arith.constant 0 : index
    %21 = vector.load %arg8[%c0_21, %c0_22, %c0_23] : memref<2x64x32xbf16, #tpu.memory_space<vmem>>, vector<1x64x32xbf16>
    %22 = vector.shape_cast %21 : vector<1x64x32xbf16> to vector<64x32xbf16>
    %c0_24 = arith.constant 0 : index
    %c0_25 = arith.constant 0 : index
    %c0_26 = arith.constant 0 : index
    %23 = vector.load %arg9[%c0_24, %c0_25, %c0_26] : memref<2x1x32xf32, #tpu.memory_space<vmem>>, vector<1x1x32xf32>
    %24 = vector.shape_cast %23 : vector<1x1x32xf32> to vector<1x32xf32>
    %c0_27 = arith.constant 0 : index
    %c0_28 = arith.constant 0 : index
    %c0_29 = arith.constant 0 : index
    %25 = vector.load %arg10[%c0_27, %c0_28, %c0_29] : memref<2x1x32xf32, #tpu.memory_space<vmem>>, vector<1x1x32xf32>
    %26 = vector.shape_cast %25 : vector<1x1x32xf32> to vector<1x32xf32>
    %c0_30 = arith.constant 0 : index
    %c0_31 = arith.constant 0 : index
    %c0_32 = arith.constant 0 : index
    %27 = vector.load %arg11[%c0_30, %c0_31, %c0_32] : memref<2x1x32xf32, #tpu.memory_space<vmem>>, vector<1x1x32xf32>
    %28 = vector.shape_cast %27 : vector<1x1x32xf32> to vector<1x32xf32>
    %29 = arith.truncf %8 : vector<16x32xf32> to vector<16x32xbf16>
    %cst_33 = arith.constant dense<0.000000e+00> : vector<16x96xf32>
    %30 = tpu.matmul %29, %10, %cst_33 {dimension_numbers = #tpu.dot_dimension_numbers<[1], [0], [0], [1], [0, 0, 1, 1], [], []>} : vector<16x32xbf16>, vector<32x96xbf16>, vector<16x96xf32> -> vector<16x96xf32>
    %31 = arith.truncf %30 : vector<16x96xf32> to vector<16x96xbf16>
    %32 = vector.extract_strided_slice %31 {offsets = [0, 0], sizes = [16, 8], strides = [1, 1]} : vector<16x96xbf16> to vector<16x8xbf16>
    %33 = vector.shape_cast %32 : vector<16x8xbf16> to vector<2x8x8xbf16>
    %34 = vector.extract_strided_slice %31 {offsets = [0, 32], sizes = [16, 8], strides = [1, 1]} : vector<16x96xbf16> to vector<16x8xbf16>
    %35 = vector.shape_cast %34 : vector<16x8xbf16> to vector<2x8x8xbf16>
    %36 = vector.extract_strided_slice %31 {offsets = [0, 64], sizes = [16, 8], strides = [1, 1]} : vector<16x96xbf16> to vector<16x8xbf16>
    %37 = vector.shape_cast %36 : vector<16x8xbf16> to vector<2x8x8xbf16>
    "tpu.trace_start"() <{level = 10 : i32, message = "bqd,bkd->bqk"}> : () -> ()
    %cst_34 = arith.constant dense<0.000000e+00> : vector<2x8x8xf32>
    %38 = tpu.matmul %33, %35, %cst_34 {dimension_numbers = #tpu.dot_dimension_numbers<[2], [2], [1], [1], [0, 0, 0, 1, 1, 1], [0], [0]>} : vector<2x8x8xbf16>, vector<2x8x8xbf16>, vector<2x8x8xf32> -> vector<2x8x8xf32>
    "tpu.trace_stop"() : () -> ()
    %cst_35 = arith.constant dense<0xFF800000> : vector<2x8xf32>
    %39 = vector.multi_reduction <maximumf>, %38, %cst_35 [2] : vector<2x8x8xf32> to vector<2x8xf32>
    %40 = vector.shape_cast %39 : vector<2x8xf32> to vector<2x8x1xf32>
    %41 = vector.broadcast %40 : vector<2x8x1xf32> to vector<2x8x8xf32>
    %42 = arith.subf %38, %41 : vector<2x8x8xf32>
    %43 = math.exp %42 : vector<2x8x8xf32>
    %cst_36 = arith.constant dense<0.000000e+00> : vector<2x8xf32>
    %44 = vector.multi_reduction <add>, %43, %cst_36 [2] : vector<2x8x8xf32> to vector<2x8xf32>
    %45 = vector.shape_cast %44 : vector<2x8xf32> to vector<2x8x1xf32>
    %46 = tpu.reciprocal %45 {approx = true} : vector<2x8x1xf32> -> vector<2x8x1xf32>
    %47 = vector.broadcast %46 : vector<2x8x1xf32> to vector<2x8x8xf32>
    %48 = arith.mulf %43, %47 : vector<2x8x8xf32>
    %49 = arith.truncf %48 : vector<2x8x8xf32> to vector<2x8x8xbf16>
    "tpu.trace_start"() <{level = 10 : i32, message = "bqk,bkd->bqd"}> : () -> ()
    %cst_37 = arith.constant dense<0.000000e+00> : vector<2x8x8xf32>
    %50 = tpu.matmul %49, %37, %cst_37 {dimension_numbers = #tpu.dot_dimension_numbers<[2], [1], [1], [2], [0, 0, 0, 1, 1, 2], [0], [0]>} : vector<2x8x8xbf16>, vector<2x8x8xbf16>, vector<2x8x8xf32> -> vector<2x8x8xf32>
    "tpu.trace_stop"() : () -> ()
    %51 = vector.shape_cast %50 : vector<2x8x8xf32> to vector<16x8xf32>
    %52 = vector.extract_strided_slice %31 {offsets = [0, 8], sizes = [16, 8], strides = [1, 1]} : vector<16x96xbf16> to vector<16x8xbf16>
    %53 = vector.shape_cast %52 : vector<16x8xbf16> to vector<2x8x8xbf16>
    %54 = vector.extract_strided_slice %31 {offsets = [0, 40], sizes = [16, 8], strides = [1, 1]} : vector<16x96xbf16> to vector<16x8xbf16>
    %55 = vector.shape_cast %54 : vector<16x8xbf16> to vector<2x8x8xbf16>
    %56 = vector.extract_strided_slice %31 {offsets = [0, 72], sizes = [16, 8], strides = [1, 1]} : vector<16x96xbf16> to vector<16x8xbf16>
    %57 = vector.shape_cast %56 : vector<16x8xbf16> to vector<2x8x8xbf16>
    "tpu.trace_start"() <{level = 10 : i32, message = "bqd,bkd->bqk"}> : () -> ()
    %cst_38 = arith.constant dense<0.000000e+00> : vector<2x8x8xf32>
    %58 = tpu.matmul %53, %55, %cst_38 {dimension_numbers = #tpu.dot_dimension_numbers<[2], [2], [1], [1], [0, 0, 0, 1, 1, 1], [0], [0]>} : vector<2x8x8xbf16>, vector<2x8x8xbf16>, vector<2x8x8xf32> -> vector<2x8x8xf32>
    "tpu.trace_stop"() : () -> ()
    %cst_39 = arith.constant dense<0xFF800000> : vector<2x8xf32>
    %59 = vector.multi_reduction <maximumf>, %58, %cst_39 [2] : vector<2x8x8xf32> to vector<2x8xf32>
    %60 = vector.shape_cast %59 : vector<2x8xf32> to vector<2x8x1xf32>
    %61 = vector.broadcast %60 : vector<2x8x1xf32> to vector<2x8x8xf32>
    %62 = arith.subf %58, %61 : vector<2x8x8xf32>
    %63 = math.exp %62 : vector<2x8x8xf32>
    %cst_40 = arith.constant dense<0.000000e+00> : vector<2x8xf32>
    %64 = vector.multi_reduction <add>, %63, %cst_40 [2] : vector<2x8x8xf32> to vector<2x8xf32>
    %65 = vector.shape_cast %64 : vector<2x8xf32> to vector<2x8x1xf32>
    %66 = tpu.reciprocal %65 {approx = true} : vector<2x8x1xf32> -> vector<2x8x1xf32>
    %67 = vector.broadcast %66 : vector<2x8x1xf32> to vector<2x8x8xf32>
    %68 = arith.mulf %63, %67 : vector<2x8x8xf32>
    %69 = arith.truncf %68 : vector<2x8x8xf32> to vector<2x8x8xbf16>
    "tpu.trace_start"() <{level = 10 : i32, message = "bqk,bkd->bqd"}> : () -> ()
    %cst_41 = arith.constant dense<0.000000e+00> : vector<2x8x8xf32>
    %70 = tpu.matmul %69, %57, %cst_41 {dimension_numbers = #tpu.dot_dimension_numbers<[2], [1], [1], [2], [0, 0, 0, 1, 1, 2], [0], [0]>} : vector<2x8x8xbf16>, vector<2x8x8xbf16>, vector<2x8x8xf32> -> vector<2x8x8xf32>
    "tpu.trace_stop"() : () -> ()
    %71 = vector.shape_cast %70 : vector<2x8x8xf32> to vector<16x8xf32>
    %72 = vector.extract_strided_slice %31 {offsets = [0, 16], sizes = [16, 8], strides = [1, 1]} : vector<16x96xbf16> to vector<16x8xbf16>
    %73 = vector.shape_cast %72 : vector<16x8xbf16> to vector<2x8x8xbf16>
    %74 = vector.extract_strided_slice %31 {offsets = [0, 48], sizes = [16, 8], strides = [1, 1]} : vector<16x96xbf16> to vector<16x8xbf16>
    %75 = vector.shape_cast %74 : vector<16x8xbf16> to vector<2x8x8xbf16>
    %76 = vector.extract_strided_slice %31 {offsets = [0, 80], sizes = [16, 8], strides = [1, 1]} : vector<16x96xbf16> to vector<16x8xbf16>
    %77 = vector.shape_cast %76 : vector<16x8xbf16> to vector<2x8x8xbf16>
    "tpu.trace_start"() <{level = 10 : i32, message = "bqd,bkd->bqk"}> : () -> ()
    %cst_42 = arith.constant dense<0.000000e+00> : vector<2x8x8xf32>
    %78 = tpu.matmul %73, %75, %cst_42 {dimension_numbers = #tpu.dot_dimension_numbers<[2], [2], [1], [1], [0, 0, 0, 1, 1, 1], [0], [0]>} : vector<2x8x8xbf16>, vector<2x8x8xbf16>, vector<2x8x8xf32> -> vector<2x8x8xf32>
    "tpu.trace_stop"() : () -> ()
    %cst_43 = arith.constant dense<0xFF800000> : vector<2x8xf32>
    %79 = vector.multi_reduction <maximumf>, %78, %cst_43 [2] : vector<2x8x8xf32> to vector<2x8xf32>
    %80 = vector.shape_cast %79 : vector<2x8xf32> to vector<2x8x1xf32>
    %81 = vector.broadcast %80 : vector<2x8x1xf32> to vector<2x8x8xf32>
    %82 = arith.subf %78, %81 : vector<2x8x8xf32>
    %83 = math.exp %82 : vector<2x8x8xf32>
    %cst_44 = arith.constant dense<0.000000e+00> : vector<2x8xf32>
    %84 = vector.multi_reduction <add>, %83, %cst_44 [2] : vector<2x8x8xf32> to vector<2x8xf32>
    %85 = vector.shape_cast %84 : vector<2x8xf32> to vector<2x8x1xf32>
    %86 = tpu.reciprocal %85 {approx = true} : vector<2x8x1xf32> -> vector<2x8x1xf32>
    %87 = vector.broadcast %86 : vector<2x8x1xf32> to vector<2x8x8xf32>
    %88 = arith.mulf %83, %87 : vector<2x8x8xf32>
    %89 = arith.truncf %88 : vector<2x8x8xf32> to vector<2x8x8xbf16>
    "tpu.trace_start"() <{level = 10 : i32, message = "bqk,bkd->bqd"}> : () -> ()
    %cst_45 = arith.constant dense<0.000000e+00> : vector<2x8x8xf32>
    %90 = tpu.matmul %89, %77, %cst_45 {dimension_numbers = #tpu.dot_dimension_numbers<[2], [1], [1], [2], [0, 0, 0, 1, 1, 2], [0], [0]>} : vector<2x8x8xbf16>, vector<2x8x8xbf16>, vector<2x8x8xf32> -> vector<2x8x8xf32>
    "tpu.trace_stop"() : () -> ()
    %91 = vector.shape_cast %90 : vector<2x8x8xf32> to vector<16x8xf32>
    %92 = vector.extract_strided_slice %31 {offsets = [0, 24], sizes = [16, 8], strides = [1, 1]} : vector<16x96xbf16> to vector<16x8xbf16>
    %93 = vector.shape_cast %92 : vector<16x8xbf16> to vector<2x8x8xbf16>
    %94 = vector.extract_strided_slice %31 {offsets = [0, 56], sizes = [16, 8], strides = [1, 1]} : vector<16x96xbf16> to vector<16x8xbf16>
    %95 = vector.shape_cast %94 : vector<16x8xbf16> to vector<2x8x8xbf16>
    %96 = vector.extract_strided_slice %31 {offsets = [0, 88], sizes = [16, 8], strides = [1, 1]} : vector<16x96xbf16> to vector<16x8xbf16>
    %97 = vector.shape_cast %96 : vector<16x8xbf16> to vector<2x8x8xbf16>
    "tpu.trace_start"() <{level = 10 : i32, message = "bqd,bkd->bqk"}> : () -> ()
    %cst_46 = arith.constant dense<0.000000e+00> : vector<2x8x8xf32>
    %98 = tpu.matmul %93, %95, %cst_46 {dimension_numbers = #tpu.dot_dimension_numbers<[2], [2], [1], [1], [0, 0, 0, 1, 1, 1], [0], [0]>} : vector<2x8x8xbf16>, vector<2x8x8xbf16>, vector<2x8x8xf32> -> vector<2x8x8xf32>
    "tpu.trace_stop"() : () -> ()
    %cst_47 = arith.constant dense<0xFF800000> : vector<2x8xf32>
    %99 = vector.multi_reduction <maximumf>, %98, %cst_47 [2] : vector<2x8x8xf32> to vector<2x8xf32>
    %100 = vector.shape_cast %99 : vector<2x8xf32> to vector<2x8x1xf32>
    %101 = vector.broadcast %100 : vector<2x8x1xf32> to vector<2x8x8xf32>
    %102 = arith.subf %98, %101 : vector<2x8x8xf32>
    %103 = math.exp %102 : vector<2x8x8xf32>
    %cst_48 = arith.constant dense<0.000000e+00> : vector<2x8xf32>
    %104 = vector.multi_reduction <add>, %103, %cst_48 [2] : vector<2x8x8xf32> to vector<2x8xf32>
    %105 = vector.shape_cast %104 : vector<2x8xf32> to vector<2x8x1xf32>
    %106 = tpu.reciprocal %105 {approx = true} : vector<2x8x1xf32> -> vector<2x8x1xf32>
    %107 = vector.broadcast %106 : vector<2x8x1xf32> to vector<2x8x8xf32>
    %108 = arith.mulf %103, %107 : vector<2x8x8xf32>
    %109 = arith.truncf %108 : vector<2x8x8xf32> to vector<2x8x8xbf16>
    "tpu.trace_start"() <{level = 10 : i32, message = "bqk,bkd->bqd"}> : () -> ()
    %cst_49 = arith.constant dense<0.000000e+00> : vector<2x8x8xf32>
    %110 = tpu.matmul %109, %97, %cst_49 {dimension_numbers = #tpu.dot_dimension_numbers<[2], [1], [1], [2], [0, 0, 0, 1, 1, 2], [0], [0]>} : vector<2x8x8xbf16>, vector<2x8x8xbf16>, vector<2x8x8xf32> -> vector<2x8x8xf32>
    "tpu.trace_stop"() : () -> ()
    %111 = vector.shape_cast %110 : vector<2x8x8xf32> to vector<16x8xf32>
    %112 = tpu.concatenate %51, %71, %91, %111 in 1 : vector<16x8xf32>, vector<16x8xf32>, vector<16x8xf32>, vector<16x8xf32> -> vector<16x32xf32>
    %113 = arith.truncf %112 : vector<16x32xf32> to vector<16x32xbf16>
    %cst_50 = arith.constant dense<0.000000e+00> : vector<16x32xf32>
    %114 = tpu.matmul %113, %12, %cst_50 {dimension_numbers = #tpu.dot_dimension_numbers<[1], [0], [0], [1], [0, 0, 1, 1], [], []>} : vector<16x32xbf16>, vector<32x32xbf16>, vector<16x32xf32> -> vector<16x32xf32>
    %115 = arith.addf %8, %114 : vector<16x32xf32>
    %cst_51 = arith.constant dense<0.000000e+00> : vector<16xf32>
    %116 = vector.multi_reduction <add>, %115, %cst_51 [1] : vector<16x32xf32> to vector<16xf32>
    %117 = vector.shape_cast %116 : vector<16xf32> to vector<16x1xf32>
    %cst_52 = arith.constant 3.200000e+01 : f32
    %118 = vector.broadcast %cst_52 : f32 to vector<16x1xf32>
    %119 = arith.divf %117, %118 : vector<16x1xf32>
    %120 = arith.mulf %115, %115 : vector<16x32xf32>
    %cst_53 = arith.constant dense<0.000000e+00> : vector<16xf32>
    %121 = vector.multi_reduction <add>, %120, %cst_53 [1] : vector<16x32xf32> to vector<16xf32>
    %122 = vector.shape_cast %121 : vector<16xf32> to vector<16x1xf32>
    %cst_54 = arith.constant 3.200000e+01 : f32
    %123 = vector.broadcast %cst_54 : f32 to vector<16x1xf32>
    %124 = arith.divf %122, %123 : vector<16x1xf32>
    %125 = arith.mulf %119, %119 : vector<16x1xf32>
    %126 = arith.subf %124, %125 : vector<16x1xf32>
    %127 = vector.broadcast %119 : vector<16x1xf32> to vector<16x32xf32>
    %128 = arith.subf %115, %127 : vector<16x32xf32>
    %cst_55 = arith.constant 9.99999974E-6 : f32
    %129 = vector.broadcast %cst_55 : f32 to vector<16x1xf32>
    %130 = arith.addf %126, %129 : vector<16x1xf32>
    %131 = math.rsqrt %130 : vector<16x1xf32>
    %132 = vector.broadcast %131 : vector<16x1xf32> to vector<16x32xf32>
    %133 = arith.mulf %128, %132 : vector<16x32xf32>
    %134 = vector.broadcast %14 : vector<1x32xf32> to vector<16x32xf32>
    %135 = arith.mulf %133, %134 : vector<16x32xf32>
    %136 = vector.broadcast %16 : vector<1x32xf32> to vector<16x32xf32>
    %137 = arith.addf %135, %136 : vector<16x32xf32>
    %138 = arith.truncf %137 : vector<16x32xf32> to vector<16x32xbf16>
    %cst_56 = arith.constant dense<0.000000e+00> : vector<16x64xf32>
    %139 = tpu.matmul %138, %18, %cst_56 {dimension_numbers = #tpu.dot_dimension_numbers<[1], [0], [0], [1], [0, 0, 1, 1], [], []>} : vector<16x32xbf16>, vector<32x64xbf16>, vector<16x64xf32> -> vector<16x64xf32>
    %140 = vector.broadcast %20 : vector<1x64xf32> to vector<16x64xf32>
    %141 = arith.addf %139, %140 : vector<16x64xf32>
    %cst_57 = arith.constant 0.000000e+00 : f32
    %142 = vector.broadcast %cst_57 : f32 to vector<16x64xf32>
    %143 = arith.maximumf %141, %142 : vector<16x64xf32>
    %144 = arith.truncf %143 : vector<16x64xf32> to vector<16x64xbf16>
    %cst_58 = arith.constant dense<0.000000e+00> : vector<16x32xf32>
    %145 = tpu.matmul %144, %22, %cst_58 {dimension_numbers = #tpu.dot_dimension_numbers<[1], [0], [0], [1], [0, 0, 1, 1], [], []>} : vector<16x64xbf16>, vector<64x32xbf16>, vector<16x32xf32> -> vector<16x32xf32>
    %146 = vector.broadcast %24 : vector<1x32xf32> to vector<16x32xf32>
    %147 = arith.addf %145, %146 : vector<16x32xf32>
    %148 = arith.addf %137, %147 : vector<16x32xf32>
    %cst_59 = arith.constant dense<0.000000e+00> : vector<16xf32>
    %149 = vector.multi_reduction <add>, %148, %cst_59 [1] : vector<16x32xf32> to vector<16xf32>
    %150 = vector.shape_cast %149 : vector<16xf32> to vector<16x1xf32>
    %cst_60 = arith.constant 3.200000e+01 : f32
    %151 = vector.broadcast %cst_60 : f32 to vector<16x1xf32>
    %152 = arith.divf %150, %151 : vector<16x1xf32>
    %153 = arith.mulf %148, %148 : vector<16x32xf32>
    %cst_61 = arith.constant dense<0.000000e+00> : vector<16xf32>
    %154 = vector.multi_reduction <add>, %153, %cst_61 [1] : vector<16x32xf32> to vector<16xf32>
    %155 = vector.shape_cast %154 : vector<16xf32> to vector<16x1xf32>
    %cst_62 = arith.constant 3.200000e+01 : f32
    %156 = vector.broadcast %cst_62 : f32 to vector<16x1xf32>
    %157 = arith.divf %155, %156 : vector<16x1xf32>
    %158 = arith.mulf %152, %152 : vector<16x1xf32>
    %159 = arith.subf %157, %158 : vector<16x1xf32>
    %160 = vector.broadcast %152 : vector<16x1xf32> to vector<16x32xf32>
    %161 = arith.subf %148, %160 : vector<16x32xf32>
    %cst_63 = arith.constant 9.99999974E-6 : f32
    %162 = vector.broadcast %cst_63 : f32 to vector<16x1xf32>
    %163 = arith.addf %159, %162 : vector<16x1xf32>
    %164 = math.rsqrt %163 : vector<16x1xf32>
    %165 = vector.broadcast %164 : vector<16x1xf32> to vector<16x32xf32>
    %166 = arith.mulf %161, %165 : vector<16x32xf32>
    %167 = vector.broadcast %26 : vector<1x32xf32> to vector<16x32xf32>
    %168 = arith.mulf %166, %167 : vector<16x32xf32>
    %169 = vector.broadcast %28 : vector<1x32xf32> to vector<16x32xf32>
    %170 = arith.addf %168, %169 : vector<16x32xf32>
    %c1 = arith.constant 1 : index
    %c0_64 = arith.constant 0 : index
    %c0_65 = arith.constant 0 : index
    %171 = vector.load %arg2[%c1, %c0_64, %c0_65] : memref<2x32x96xbf16, #tpu.memory_space<vmem>>, vector<1x32x96xbf16>
    %172 = vector.shape_cast %171 : vector<1x32x96xbf16> to vector<32x96xbf16>
    %c1_66 = arith.constant 1 : index
    %c0_67 = arith.constant 0 : index
    %c0_68 = arith.constant 0 : index
    %173 = vector.load %arg3[%c1_66, %c0_67, %c0_68] : memref<2x32x32xbf16, #tpu.memory_space<vmem>>, vector<1x32x32xbf16>
    %174 = vector.shape_cast %173 : vector<1x32x32xbf16> to vector<32x32xbf16>
    %c1_69 = arith.constant 1 : index
    %c0_70 = arith.constant 0 : index
    %c0_71 = arith.constant 0 : index
    %175 = vector.load %arg4[%c1_69, %c0_70, %c0_71] : memref<2x1x32xf32, #tpu.memory_space<vmem>>, vector<1x1x32xf32>
    %176 = vector.shape_cast %175 : vector<1x1x32xf32> to vector<1x32xf32>
    %c1_72 = arith.constant 1 : index
    %c0_73 = arith.constant 0 : index
    %c0_74 = arith.constant 0 : index
    %177 = vector.load %arg5[%c1_72, %c0_73, %c0_74] : memref<2x1x32xf32, #tpu.memory_space<vmem>>, vector<1x1x32xf32>
    %178 = vector.shape_cast %177 : vector<1x1x32xf32> to vector<1x32xf32>
    %c1_75 = arith.constant 1 : index
    %c0_76 = arith.constant 0 : index
    %c0_77 = arith.constant 0 : index
    %179 = vector.load %arg6[%c1_75, %c0_76, %c0_77] : memref<2x32x64xbf16, #tpu.memory_space<vmem>>, vector<1x32x64xbf16>
    %180 = vector.shape_cast %179 : vector<1x32x64xbf16> to vector<32x64xbf16>
    %c1_78 = arith.constant 1 : index
    %c0_79 = arith.constant 0 : index
    %c0_80 = arith.constant 0 : index
    %181 = vector.load %arg7[%c1_78, %c0_79, %c0_80] : memref<2x1x64xf32, #tpu.memory_space<vmem>>, vector<1x1x64xf32>
    %182 = vector.shape_cast %181 : vector<1x1x64xf32> to vector<1x64xf32>
    %c1_81 = arith.constant 1 : index
    %c0_82 = arith.constant 0 : index
    %c0_83 = arith.constant 0 : index
    %183 = vector.load %arg8[%c1_81, %c0_82, %c0_83] : memref<2x64x32xbf16, #tpu.memory_space<vmem>>, vector<1x64x32xbf16>
    %184 = vector.shape_cast %183 : vector<1x64x32xbf16> to vector<64x32xbf16>
    %c1_84 = arith.constant 1 : index
    %c0_85 = arith.constant 0 : index
    %c0_86 = arith.constant 0 : index
    %185 = vector.load %arg9[%c1_84, %c0_85, %c0_86] : memref<2x1x32xf32, #tpu.memory_space<vmem>>, vector<1x1x32xf32>
    %186 = vector.shape_cast %185 : vector<1x1x32xf32> to vector<1x32xf32>
    %c1_87 = arith.constant 1 : index
    %c0_88 = arith.constant 0 : index
    %c0_89 = arith.constant 0 : index
    %187 = vector.load %arg10[%c1_87, %c0_88, %c0_89] : memref<2x1x32xf32, #tpu.memory_space<vmem>>, vector<1x1x32xf32>
    %188 = vector.shape_cast %187 : vector<1x1x32xf32> to vector<1x32xf32>
    %c1_90 = arith.constant 1 : index
    %c0_91 = arith.constant 0 : index
    %c0_92 = arith.constant 0 : index
    %189 = vector.load %arg11[%c1_90, %c0_91, %c0_92] : memref<2x1x32xf32, #tpu.memory_space<vmem>>, vector<1x1x32xf32>
    %190 = vector.shape_cast %189 : vector<1x1x32xf32> to vector<1x32xf32>
    %191 = arith.truncf %170 : vector<16x32xf32> to vector<16x32xbf16>
    %cst_93 = arith.constant dense<0.000000e+00> : vector<16x96xf32>
    %192 = tpu.matmul %191, %172, %cst_93 {dimension_numbers = #tpu.dot_dimension_numbers<[1], [0], [0], [1], [0, 0, 1, 1], [], []>} : vector<16x32xbf16>, vector<32x96xbf16>, vector<16x96xf32> -> vector<16x96xf32>
    %193 = arith.truncf %192 : vector<16x96xf32> to vector<16x96xbf16>
    %194 = vector.extract_strided_slice %193 {offsets = [0, 0], sizes = [16, 8], strides = [1, 1]} : vector<16x96xbf16> to vector<16x8xbf16>
    %195 = vector.shape_cast %194 : vector<16x8xbf16> to vector<2x8x8xbf16>
    %196 = vector.extract_strided_slice %193 {offsets = [0, 32], sizes = [16, 8], strides = [1, 1]} : vector<16x96xbf16> to vector<16x8xbf16>
    %197 = vector.shape_cast %196 : vector<16x8xbf16> to vector<2x8x8xbf16>
    %198 = vector.extract_strided_slice %193 {offsets = [0, 64], sizes = [16, 8], strides = [1, 1]} : vector<16x96xbf16> to vector<16x8xbf16>
    %199 = vector.shape_cast %198 : vector<16x8xbf16> to vector<2x8x8xbf16>
    "tpu.trace_start"() <{level = 10 : i32, message = "bqd,bkd->bqk"}> : () -> ()
    %cst_94 = arith.constant dense<0.000000e+00> : vector<2x8x8xf32>
    %200 = tpu.matmul %195, %197, %cst_94 {dimension_numbers = #tpu.dot_dimension_numbers<[2], [2], [1], [1], [0, 0, 0, 1, 1, 1], [0], [0]>} : vector<2x8x8xbf16>, vector<2x8x8xbf16>, vector<2x8x8xf32> -> vector<2x8x8xf32>
    "tpu.trace_stop"() : () -> ()
    %cst_95 = arith.constant dense<0xFF800000> : vector<2x8xf32>
    %201 = vector.multi_reduction <maximumf>, %200, %cst_95 [2] : vector<2x8x8xf32> to vector<2x8xf32>
    %202 = vector.shape_cast %201 : vector<2x8xf32> to vector<2x8x1xf32>
    %203 = vector.broadcast %202 : vector<2x8x1xf32> to vector<2x8x8xf32>
    %204 = arith.subf %200, %203 : vector<2x8x8xf32>
    %205 = math.exp %204 : vector<2x8x8xf32>
    %cst_96 = arith.constant dense<0.000000e+00> : vector<2x8xf32>
    %206 = vector.multi_reduction <add>, %205, %cst_96 [2] : vector<2x8x8xf32> to vector<2x8xf32>
    %207 = vector.shape_cast %206 : vector<2x8xf32> to vector<2x8x1xf32>
    %208 = tpu.reciprocal %207 {approx = true} : vector<2x8x1xf32> -> vector<2x8x1xf32>
    %209 = vector.broadcast %208 : vector<2x8x1xf32> to vector<2x8x8xf32>
    %210 = arith.mulf %205, %209 : vector<2x8x8xf32>
    %211 = arith.truncf %210 : vector<2x8x8xf32> to vector<2x8x8xbf16>
    "tpu.trace_start"() <{level = 10 : i32, message = "bqk,bkd->bqd"}> : () -> ()
    %cst_97 = arith.constant dense<0.000000e+00> : vector<2x8x8xf32>
    %212 = tpu.matmul %211, %199, %cst_97 {dimension_numbers = #tpu.dot_dimension_numbers<[2], [1], [1], [2], [0, 0, 0, 1, 1, 2], [0], [0]>} : vector<2x8x8xbf16>, vector<2x8x8xbf16>, vector<2x8x8xf32> -> vector<2x8x8xf32>
    "tpu.trace_stop"() : () -> ()
    %213 = vector.shape_cast %212 : vector<2x8x8xf32> to vector<16x8xf32>
    %214 = vector.extract_strided_slice %193 {offsets = [0, 8], sizes = [16, 8], strides = [1, 1]} : vector<16x96xbf16> to vector<16x8xbf16>
    %215 = vector.shape_cast %214 : vector<16x8xbf16> to vector<2x8x8xbf16>
    %216 = vector.extract_strided_slice %193 {offsets = [0, 40], sizes = [16, 8], strides = [1, 1]} : vector<16x96xbf16> to vector<16x8xbf16>
    %217 = vector.shape_cast %216 : vector<16x8xbf16> to vector<2x8x8xbf16>
    %218 = vector.extract_strided_slice %193 {offsets = [0, 72], sizes = [16, 8], strides = [1, 1]} : vector<16x96xbf16> to vector<16x8xbf16>
    %219 = vector.shape_cast %218 : vector<16x8xbf16> to vector<2x8x8xbf16>
    "tpu.trace_start"() <{level = 10 : i32, message = "bqd,bkd->bqk"}> : () -> ()
    %cst_98 = arith.constant dense<0.000000e+00> : vector<2x8x8xf32>
    %220 = tpu.matmul %215, %217, %cst_98 {dimension_numbers = #tpu.dot_dimension_numbers<[2], [2], [1], [1], [0, 0, 0, 1, 1, 1], [0], [0]>} : vector<2x8x8xbf16>, vector<2x8x8xbf16>, vector<2x8x8xf32> -> vector<2x8x8xf32>
    "tpu.trace_stop"() : () -> ()
    %cst_99 = arith.constant dense<0xFF800000> : vector<2x8xf32>
    %221 = vector.multi_reduction <maximumf>, %220, %cst_99 [2] : vector<2x8x8xf32> to vector<2x8xf32>
    %222 = vector.shape_cast %221 : vector<2x8xf32> to vector<2x8x1xf32>
    %223 = vector.broadcast %222 : vector<2x8x1xf32> to vector<2x8x8xf32>
    %224 = arith.subf %220, %223 : vector<2x8x8xf32>
    %225 = math.exp %224 : vector<2x8x8xf32>
    %cst_100 = arith.constant dense<0.000000e+00> : vector<2x8xf32>
    %226 = vector.multi_reduction <add>, %225, %cst_100 [2] : vector<2x8x8xf32> to vector<2x8xf32>
    %227 = vector.shape_cast %226 : vector<2x8xf32> to vector<2x8x1xf32>
    %228 = tpu.reciprocal %227 {approx = true} : vector<2x8x1xf32> -> vector<2x8x1xf32>
    %229 = vector.broadcast %228 : vector<2x8x1xf32> to vector<2x8x8xf32>
    %230 = arith.mulf %225, %229 : vector<2x8x8xf32>
    %231 = arith.truncf %230 : vector<2x8x8xf32> to vector<2x8x8xbf16>
    "tpu.trace_start"() <{level = 10 : i32, message = "bqk,bkd->bqd"}> : () -> ()
    %cst_101 = arith.constant dense<0.000000e+00> : vector<2x8x8xf32>
    %232 = tpu.matmul %231, %219, %cst_101 {dimension_numbers = #tpu.dot_dimension_numbers<[2], [1], [1], [2], [0, 0, 0, 1, 1, 2], [0], [0]>} : vector<2x8x8xbf16>, vector<2x8x8xbf16>, vector<2x8x8xf32> -> vector<2x8x8xf32>
    "tpu.trace_stop"() : () -> ()
    %233 = vector.shape_cast %232 : vector<2x8x8xf32> to vector<16x8xf32>
    %234 = vector.extract_strided_slice %193 {offsets = [0, 16], sizes = [16, 8], strides = [1, 1]} : vector<16x96xbf16> to vector<16x8xbf16>
    %235 = vector.shape_cast %234 : vector<16x8xbf16> to vector<2x8x8xbf16>
    %236 = vector.extract_strided_slice %193 {offsets = [0, 48], sizes = [16, 8], strides = [1, 1]} : vector<16x96xbf16> to vector<16x8xbf16>
    %237 = vector.shape_cast %236 : vector<16x8xbf16> to vector<2x8x8xbf16>
    %238 = vector.extract_strided_slice %193 {offsets = [0, 80], sizes = [16, 8], strides = [1, 1]} : vector<16x96xbf16> to vector<16x8xbf16>
    %239 = vector.shape_cast %238 : vector<16x8xbf16> to vector<2x8x8xbf16>
    "tpu.trace_start"() <{level = 10 : i32, message = "bqd,bkd->bqk"}> : () -> ()
    %cst_102 = arith.constant dense<0.000000e+00> : vector<2x8x8xf32>
    %240 = tpu.matmul %235, %237, %cst_102 {dimension_numbers = #tpu.dot_dimension_numbers<[2], [2], [1], [1], [0, 0, 0, 1, 1, 1], [0], [0]>} : vector<2x8x8xbf16>, vector<2x8x8xbf16>, vector<2x8x8xf32> -> vector<2x8x8xf32>
    "tpu.trace_stop"() : () -> ()
    %cst_103 = arith.constant dense<0xFF800000> : vector<2x8xf32>
    %241 = vector.multi_reduction <maximumf>, %240, %cst_103 [2] : vector<2x8x8xf32> to vector<2x8xf32>
    %242 = vector.shape_cast %241 : vector<2x8xf32> to vector<2x8x1xf32>
    %243 = vector.broadcast %242 : vector<2x8x1xf32> to vector<2x8x8xf32>
    %244 = arith.subf %240, %243 : vector<2x8x8xf32>
    %245 = math.exp %244 : vector<2x8x8xf32>
    %cst_104 = arith.constant dense<0.000000e+00> : vector<2x8xf32>
    %246 = vector.multi_reduction <add>, %245, %cst_104 [2] : vector<2x8x8xf32> to vector<2x8xf32>
    %247 = vector.shape_cast %246 : vector<2x8xf32> to vector<2x8x1xf32>
    %248 = tpu.reciprocal %247 {approx = true} : vector<2x8x1xf32> -> vector<2x8x1xf32>
    %249 = vector.broadcast %248 : vector<2x8x1xf32> to vector<2x8x8xf32>
    %250 = arith.mulf %245, %249 : vector<2x8x8xf32>
    %251 = arith.truncf %250 : vector<2x8x8xf32> to vector<2x8x8xbf16>
    "tpu.trace_start"() <{level = 10 : i32, message = "bqk,bkd->bqd"}> : () -> ()
    %cst_105 = arith.constant dense<0.000000e+00> : vector<2x8x8xf32>
    %252 = tpu.matmul %251, %239, %cst_105 {dimension_numbers = #tpu.dot_dimension_numbers<[2], [1], [1], [2], [0, 0, 0, 1, 1, 2], [0], [0]>} : vector<2x8x8xbf16>, vector<2x8x8xbf16>, vector<2x8x8xf32> -> vector<2x8x8xf32>
    "tpu.trace_stop"() : () -> ()
    %253 = vector.shape_cast %252 : vector<2x8x8xf32> to vector<16x8xf32>
    %254 = vector.extract_strided_slice %193 {offsets = [0, 24], sizes = [16, 8], strides = [1, 1]} : vector<16x96xbf16> to vector<16x8xbf16>
    %255 = vector.shape_cast %254 : vector<16x8xbf16> to vector<2x8x8xbf16>
    %256 = vector.extract_strided_slice %193 {offsets = [0, 56], sizes = [16, 8], strides = [1, 1]} : vector<16x96xbf16> to vector<16x8xbf16>
    %257 = vector.shape_cast %256 : vector<16x8xbf16> to vector<2x8x8xbf16>
    %258 = vector.extract_strided_slice %193 {offsets = [0, 88], sizes = [16, 8], strides = [1, 1]} : vector<16x96xbf16> to vector<16x8xbf16>
    %259 = vector.shape_cast %258 : vector<16x8xbf16> to vector<2x8x8xbf16>
    "tpu.trace_start"() <{level = 10 : i32, message = "bqd,bkd->bqk"}> : () -> ()
    %cst_106 = arith.constant dense<0.000000e+00> : vector<2x8x8xf32>
    %260 = tpu.matmul %255, %257, %cst_106 {dimension_numbers = #tpu.dot_dimension_numbers<[2], [2], [1], [1], [0, 0, 0, 1, 1, 1], [0], [0]>} : vector<2x8x8xbf16>, vector<2x8x8xbf16>, vector<2x8x8xf32> -> vector<2x8x8xf32>
    "tpu.trace_stop"() : () -> ()
    %cst_107 = arith.constant dense<0xFF800000> : vector<2x8xf32>
    %261 = vector.multi_reduction <maximumf>, %260, %cst_107 [2] : vector<2x8x8xf32> to vector<2x8xf32>
    %262 = vector.shape_cast %261 : vector<2x8xf32> to vector<2x8x1xf32>
    %263 = vector.broadcast %262 : vector<2x8x1xf32> to vector<2x8x8xf32>
    %264 = arith.subf %260, %263 : vector<2x8x8xf32>
    %265 = math.exp %264 : vector<2x8x8xf32>
    %cst_108 = arith.constant dense<0.000000e+00> : vector<2x8xf32>
    %266 = vector.multi_reduction <add>, %265, %cst_108 [2] : vector<2x8x8xf32> to vector<2x8xf32>
    %267 = vector.shape_cast %266 : vector<2x8xf32> to vector<2x8x1xf32>
    %268 = tpu.reciprocal %267 {approx = true} : vector<2x8x1xf32> -> vector<2x8x1xf32>
    %269 = vector.broadcast %268 : vector<2x8x1xf32> to vector<2x8x8xf32>
    %270 = arith.mulf %265, %269 : vector<2x8x8xf32>
    %271 = arith.truncf %270 : vector<2x8x8xf32> to vector<2x8x8xbf16>
    "tpu.trace_start"() <{level = 10 : i32, message = "bqk,bkd->bqd"}> : () -> ()
    %cst_109 = arith.constant dense<0.000000e+00> : vector<2x8x8xf32>
    %272 = tpu.matmul %271, %259, %cst_109 {dimension_numbers = #tpu.dot_dimension_numbers<[2], [1], [1], [2], [0, 0, 0, 1, 1, 2], [0], [0]>} : vector<2x8x8xbf16>, vector<2x8x8xbf16>, vector<2x8x8xf32> -> vector<2x8x8xf32>
    "tpu.trace_stop"() : () -> ()
    %273 = vector.shape_cast %272 : vector<2x8x8xf32> to vector<16x8xf32>
    %274 = tpu.concatenate %213, %233, %253, %273 in 1 : vector<16x8xf32>, vector<16x8xf32>, vector<16x8xf32>, vector<16x8xf32> -> vector<16x32xf32>
    %275 = arith.truncf %274 : vector<16x32xf32> to vector<16x32xbf16>
    %cst_110 = arith.constant dense<0.000000e+00> : vector<16x32xf32>
    %276 = tpu.matmul %275, %174, %cst_110 {dimension_numbers = #tpu.dot_dimension_numbers<[1], [0], [0], [1], [0, 0, 1, 1], [], []>} : vector<16x32xbf16>, vector<32x32xbf16>, vector<16x32xf32> -> vector<16x32xf32>
    %277 = arith.addf %170, %276 : vector<16x32xf32>
    %cst_111 = arith.constant dense<0.000000e+00> : vector<16xf32>
    %278 = vector.multi_reduction <add>, %277, %cst_111 [1] : vector<16x32xf32> to vector<16xf32>
    %279 = vector.shape_cast %278 : vector<16xf32> to vector<16x1xf32>
    %cst_112 = arith.constant 3.200000e+01 : f32
    %280 = vector.broadcast %cst_112 : f32 to vector<16x1xf32>
    %281 = arith.divf %279, %280 : vector<16x1xf32>
    %282 = arith.mulf %277, %277 : vector<16x32xf32>
    %cst_113 = arith.constant dense<0.000000e+00> : vector<16xf32>
    %283 = vector.multi_reduction <add>, %282, %cst_113 [1] : vector<16x32xf32> to vector<16xf32>
    %284 = vector.shape_cast %283 : vector<16xf32> to vector<16x1xf32>
    %cst_114 = arith.constant 3.200000e+01 : f32
    %285 = vector.broadcast %cst_114 : f32 to vector<16x1xf32>
    %286 = arith.divf %284, %285 : vector<16x1xf32>
    %287 = arith.mulf %281, %281 : vector<16x1xf32>
    %288 = arith.subf %286, %287 : vector<16x1xf32>
    %289 = vector.broadcast %281 : vector<16x1xf32> to vector<16x32xf32>
    %290 = arith.subf %277, %289 : vector<16x32xf32>
    %cst_115 = arith.constant 9.99999974E-6 : f32
    %291 = vector.broadcast %cst_115 : f32 to vector<16x1xf32>
    %292 = arith.addf %288, %291 : vector<16x1xf32>
    %293 = math.rsqrt %292 : vector<16x1xf32>
    %294 = vector.broadcast %293 : vector<16x1xf32> to vector<16x32xf32>
    %295 = arith.mulf %290, %294 : vector<16x32xf32>
    %296 = vector.broadcast %176 : vector<1x32xf32> to vector<16x32xf32>
    %297 = arith.mulf %295, %296 : vector<16x32xf32>
    %298 = vector.broadcast %178 : vector<1x32xf32> to vector<16x32xf32>
    %299 = arith.addf %297, %298 : vector<16x32xf32>
    %300 = arith.truncf %299 : vector<16x32xf32> to vector<16x32xbf16>
    %cst_116 = arith.constant dense<0.000000e+00> : vector<16x64xf32>
    %301 = tpu.matmul %300, %180, %cst_116 {dimension_numbers = #tpu.dot_dimension_numbers<[1], [0], [0], [1], [0, 0, 1, 1], [], []>} : vector<16x32xbf16>, vector<32x64xbf16>, vector<16x64xf32> -> vector<16x64xf32>
    %302 = vector.broadcast %182 : vector<1x64xf32> to vector<16x64xf32>
    %303 = arith.addf %301, %302 : vector<16x64xf32>
    %cst_117 = arith.constant 0.000000e+00 : f32
    %304 = vector.broadcast %cst_117 : f32 to vector<16x64xf32>
    %305 = arith.maximumf %303, %304 : vector<16x64xf32>
    %306 = arith.truncf %305 : vector<16x64xf32> to vector<16x64xbf16>
    %cst_118 = arith.constant dense<0.000000e+00> : vector<16x32xf32>
    %307 = tpu.matmul %306, %184, %cst_118 {dimension_numbers = #tpu.dot_dimension_numbers<[1], [0], [0], [1], [0, 0, 1, 1], [], []>} : vector<16x64xbf16>, vector<64x32xbf16>, vector<16x32xf32> -> vector<16x32xf32>
    %308 = vector.broadcast %186 : vector<1x32xf32> to vector<16x32xf32>
    %309 = arith.addf %307, %308 : vector<16x32xf32>
    %310 = arith.addf %299, %309 : vector<16x32xf32>
    %cst_119 = arith.constant dense<0.000000e+00> : vector<16xf32>
    %311 = vector.multi_reduction <add>, %310, %cst_119 [1] : vector<16x32xf32> to vector<16xf32>
    %312 = vector.shape_cast %311 : vector<16xf32> to vector<16x1xf32>
    %cst_120 = arith.constant 3.200000e+01 : f32
    %313 = vector.broadcast %cst_120 : f32 to vector<16x1xf32>
    %314 = arith.divf %312, %313 : vector<16x1xf32>
    %315 = arith.mulf %310, %310 : vector<16x32xf32>
    %cst_121 = arith.constant dense<0.000000e+00> : vector<16xf32>
    %316 = vector.multi_reduction <add>, %315, %cst_121 [1] : vector<16x32xf32> to vector<16xf32>
    %317 = vector.shape_cast %316 : vector<16xf32> to vector<16x1xf32>
    %cst_122 = arith.constant 3.200000e+01 : f32
    %318 = vector.broadcast %cst_122 : f32 to vector<16x1xf32>
    %319 = arith.divf %317, %318 : vector<16x1xf32>
    %320 = arith.mulf %314, %314 : vector<16x1xf32>
    %321 = arith.subf %319, %320 : vector<16x1xf32>
    %322 = vector.broadcast %314 : vector<16x1xf32> to vector<16x32xf32>
    %323 = arith.subf %310, %322 : vector<16x32xf32>
    %cst_123 = arith.constant 9.99999974E-6 : f32
    %324 = vector.broadcast %cst_123 : f32 to vector<16x1xf32>
    %325 = arith.addf %321, %324 : vector<16x1xf32>
    %326 = math.rsqrt %325 : vector<16x1xf32>
    %327 = vector.broadcast %326 : vector<16x1xf32> to vector<16x32xf32>
    %328 = arith.mulf %323, %327 : vector<16x32xf32>
    %329 = vector.broadcast %188 : vector<1x32xf32> to vector<16x32xf32>
    %330 = arith.mulf %328, %329 : vector<16x32xf32>
    %331 = vector.broadcast %190 : vector<1x32xf32> to vector<16x32xf32>
    %332 = arith.addf %330, %331 : vector<16x32xf32>
    %c0_124 = arith.constant 0 : index
    %c0_125 = arith.constant 0 : index
    %333 = vector.load %arg12[%c0_124, %c0_125] : memref<16x32xf32, #tpu.memory_space<vmem>>, vector<16x32xf32>
    tpu.vector_store %arg12[%c0_124, %c0_125], %332 {strides = array<i32>} : memref<16x32xf32, #tpu.memory_space<vmem>>, vector<16x32xf32>,
    return
  }
}

</mosaic_0001>

<bundles_post_ra>
// kernel: tpu_custom_call.1
= control target key start
LH: loop header
LB: loop body
LE: loop exit
PB: predicated region body
PF: predicated region fallthrough
CT: control target
= control target key end

     0   :  { %17 = vsyncpa [#allocation3], 0  ;;  %s4014_s0 = inlined_call_operand.hbm [shape: f32[16,32], index: 0, kind: input, shape index: {}]   ;;  %s4015_s1 = inlined_call_operand.hbm [shape: f32[8,32], index: 1, kind: input, shape index: {}]   ;;  %s4016_s2 = inlined_call_operand.vmem [shape: bf16[2,32,96], index: 2, kind: input, shape index: {}]   ;;  %s4017_s3 = inlined_call_operand.vmem [shape: bf16[2,32,32], index: 3, kind: input, shape index: {}]   ;;  %s4018_s4 = inlined_call_operand.vmem [shape: f32[2,1,32], index: 4, kind: input, shape index: {}]   ;;  %s4019_s5 = inlined_call_operand.vmem [shape: f32[2,1,32], index: 5, kind: input, shape index: {}]   ;;  %s4020_s6 = inlined_call_operand.vmem [shape: bf16[2,32,64], index: 6, kind: input, shape index: {}]   ;;  %s4021_s7 = inlined_call_operand.vmem [shape: f32[2,1,64], index: 7, kind: input, shape index: {}]   ;;  %s4022_s8 = inlined_call_operand.vmem [shape: bf16[2,64,32], index: 8, kind: input, shape index: {}]   ;;  %s4023_s9 = inlined_call_operand.vmem [shape: f32[2,1,32], index: 9, kind: input, shape index: {}]   ;;  %s4024_s10 = inlined_call_operand.vmem [shape: f32[2,1,32], index: 10, kind: input, shape index: {}]   ;;  %s4025_s11 = inlined_call_operand.vmem [shape: f32[2,1,32], index: 11, kind: input, shape index: {}]   ;;  %s4026_s12 = inlined_call_operand.hbm [shape: f32[16,32], index: 12, kind: output, shape index: {}]  }
   0x1   :  { %18 = vsyncpa [#allocation6], 0 }
   0x2   :  { %19 = vsyncpa [#allocation4], 0  ;;  %s3373_s21 = smov [#allocation2]   ;;  %s3301_s25 = scalar_lea.hbm %s4014_s0, 256 }
   0x3   :  { %s25_s22 = sshll.u32 %s3373_s21, 4  ;;  %p3302_p0 = scmp.ne.s32.totalorder %s4014_s0, %s3301_s25  ;;  %s26_s22 = int_to_ptr.vmem [resolvable:$true] %s25_s22 }
   0x4   :  { %p3305_p1 = scmp.lt.u32.totalorder %s3301_s25, %s4014_s0 }
   0x6   :  { %p3307_p2 = pnand %p3305_p1, %p3302_p0 }
   0x8   :  { %3310 = shalt.err (!%p3307_p2)
}
   0x9   :  { %s3311_s30 = scalar_lea.vmem %s26_s22, 256  ;;  %p3316_p4 = scmp.lt.s32.totalorder %s26_s22, %s26_s22 }
   0xa   :  { %p3312_p3 = scmp.ne.s32.totalorder %s26_s22, %s3311_s30  ;;  %p3317_p5 = scmp.lt.s32.totalorder %s3311_s30, %s3311_s30 }
   0xc   :  { %p3318_p6 = por %p3317_p5, %p3316_p4 }
   0xe   :  { %p3319_p7 = pnand %p3318_p6, %p3312_p3 }
  0x10   :  { %3322 = shalt.err (!%p3319_p7)
}
  0x11   :  { %s4027_s13 = smov 128   ;;  %s3375_s14 = smov 8  }
  0x12   :  { %31 = dma.hbm_to_vmem [thread:$0]  %s4014_s0, 256, %s26_s22, [#allocation3], %s4027_s13, %s4027_s13, %s3375_s14  }
  0x13   :  { %s3376_s17 = smov [#allocation5]   ;;  %s3323_s21 = scalar_lea.hbm %s4015_s1, 128 }
  0x14   :  { %s38_s18 = sshll.u32 %s3376_s17, 4  ;;  %p3324_p8 = scmp.ne.s32.totalorder %s4015_s1, %s3323_s21  ;;  %s39_s18 = int_to_ptr.vmem [resolvable:$true] %s38_s18 }
  0x15   :  { %p3327_p9 = scmp.lt.u32.totalorder %s3323_s21, %s4015_s1 }
  0x17   :  { %p3329_p10 = pnand %p3327_p9, %p3324_p8 }
  0x19   :  { %3332 = shalt.err (!%p3329_p10)
}
  0x1a   :  { %s3333_s27 = scalar_lea.vmem %s39_s18, 128  ;;  %p3338_p12 = scmp.lt.s32.totalorder %s39_s18, %s39_s18 }
  0x1b   :  { %p3334_p11 = scmp.ne.s32.totalorder %s39_s18, %s3333_s27  ;;  %p3339_p13 = scmp.lt.s32.totalorder %s3333_s27, %s3333_s27 }
  0x1d   :  { %p3340_p0 = por %p3339_p13, %p3338_p12 }
  0x1f   :  { %p3341_p1 = pnand %p3340_p0, %p3334_p11 }
  0x21   :  { %3344 = shalt.err (!%p3341_p1)
}
  0x22   :  { %41 = dma.hbm_to_vmem [thread:$0]  %s4015_s1, 128, %s39_s18, [#allocation6]  }
  0x23   :  { %3367 = dma.done.wait [#allocation3], 256  }
  0x24   :  { %3368 = vsyncadd [#allocation3], 4294967040 }
  0x25   :  { %3369 = dma.done.wait [#allocation6], 128  }
  0x26   :  { %3370 = vsyncadd [#allocation6], 4294967168  ;;  %v3377_v0 = vmov 0.0   ;;  %vm3378_vm0 = vmmov 0   ;;  %v3201_v1 = vld [vmem:[%s4016_s2] sm:$0xff]   ;;  %v3202_v2 = vld [vmem:[%s4016_s2 + $0x8] sm:$0xff]  }
  0x27   :  { %2887 = vmatprep.subr.bf16.mxu1 %v3377_v0  ;;  %2891 = vmatprep.mubr.msk.bf16.mxu1 %vm3378_vm0, %v3377_v0  ;;  %v69_v3 = vld [vmem:[#allocation2] sm:$0xff]  ;;  %v70_v4 = vld [vmem:[#allocation2 + $0x8] sm:$0xff]  ;;  %v73_v5 = vld [vmem:[#allocation5] sm:$0xff]  ;;  %vm115_vm1 = vcmask 261120   ;;  %s3379_s15 = smov 96   ;;  %vm168_vm2 = vcmask 64512  }
  0x28   :  { %2901 = vmatprep.subr.bf16.mxu0 %v3377_v0  ;;  %2903 = vmatprep.mubr.msk.bf16.mxu0 %vm3378_vm0, %v3377_v0  ;;  %v71_v6 = vmul.f32 5.656854, %v69_v3  ;;  %v72_v7 = vmul.f32 5.656854, %v70_v4  ;;  %s3380_s16 = smov 64   ;;  %s3381_s17 = smov 88  }
  0x29   :  { %2888 = vmatpush3.bf16.msra.mxu1 %v3201_v1  ;;  %vm292_vm3 = vcmask 1043456   ;;  %s3382_s18 = smov 120   ;;  %s3383_s19 = smov 56   ;;  %vm1070_vm4 = vcmask 130048   ;;  %vm1073_vm5 = vcmask 195584   ;;  %vm1278_vm6 = vcmask 523264  }
  0x2a   :  { %2889 = vmatprep.subr.bf16.mxu1 %v3377_v0  ;;  %v3498_v8 = vadd.f32 %v73_v5, %v71_v6  ;;  %v3500_v9 = vadd.f32 %v73_v5, %v72_v7  ;;  %s3384_s20 = smov 80   ;;  %s3385_s21 = smov 112  }
  0x2b   :  { %s3386_s23 = smov 48   ;;  %s3387_s24 = smov 72  }
  0x2c   :  { %v102_v10 = vpack.c.bf16 %v3500_v9, %v3498_v8  ;;  %s3388_s25 = smov 104   ;;  %s3389_s26 = smov 40  }
  0x2d   :  { %2890 = vmatpush3.bf16.msra.mxu1 %v3202_v2  ;;  %s4029_s27 = smov 16   ;;  %s4028_s1 = smov 24  }
  0x2e   :  { %2895 = vmatprep.subr.bf16.mxu1 %v3377_v0 }
  0x30   :  { %2892 = vmatmul.mubr.msk.bf16.vlgmr.msra.gmra.mrb[0].mxu1 %vm115_vm1, %v102_v10 }
  0x31   :  { %2897 = vmatprep.mubr.msk.bf16.mxu1 %vm3378_vm0, %v3377_v0 }
 0x103   :  { %v153_v11 = vpop.f32.mrb[0].mxu1 }
 0x104   :  { %v3508_v12 = vpack.c.bf16 %v153_v11, %v153_v11  ;;  %v2893_v13 = vpop.f32.mrb[1].mxu1 }
 0x105   :  { %v156_v14 = vpop.f32.mrb[2].mxu1 }
 0x106   :  { %166 = vrot.lane.b32.xlu0 %v3508_v12, %s3379_s15  ;;  %v2894_v15 = vpop.f32.mrb[3].mxu1  ;;  %v3512_v16 = vpack.c.bf16 %v156_v14, %v156_v14 }
 0x10a   :  { %215 = vrot.lane.b32.xlu0 %v3512_v16, %s3379_s15 }
 0x178   :  { %v167_v17 = vpop.permute.xlu0 %166 }
 0x179   :  { %v173_v18 = vsel %vm168_vm2, %v167_v17, 0 }
 0x17a   :  { %2896 = vmatpush3.bf16.xpose.msra.mxu1 %v173_v18 }
 0x17b   :  { %2907 = vmatprep.subr.bf16.mxu1 %v3377_v0 }
 0x17c   :  { %v216_v19 = vpop.permute.xlu0 %215 }
 0x17d   :  { %v221_v20 = vsel %vm168_vm2, %v216_v19, 0 }
 0x17e   :  { %2902 = vmatpush3.bf16.xpose.msra.mxu0 %v221_v20 }
 0x17f   :  { %2913 = vmatprep.subr.bf16.mxu0 %v3377_v0 }
 0x181   :  { %2898 = vmatmul.mubr.msk.bf16.vlgmr.msra.gmra.mrb[4].mxu1 %vm168_vm2, %v3508_v12 }
 0x182   :  { %2909 = vmatprep.mubr.msk.bf16.mxu1 %vm3378_vm0, %v3377_v0 }
 0x185   :  { %2904 = vmatmul.mubr.msk.bf16.vlgmr.msra.gmra.mrb[0].mxu0 %vm168_vm2, %v3512_v16 }
 0x186   :  { %2915 = vmatprep.mubr.msk.bf16.mxu0 %vm3378_vm0, %v3377_v0 }
 0x254   :  { %v209_v21 = vpop.f32.mrb[4].mxu1 }
 0x255   :  { %v2899_v22 = vpop.f32.mrb[5].mxu1  ;;  %v263_v23 = vsel %vm168_vm2, %v209_v21, -inf }
 0x256   :  { %264 = vmax.xlane.f32.xlu1 %v263_v23  ;;  %v212_v24 = vpop.f32.mrb[6].mxu1 }
 0x257   :  { %v2900_v25 = vpop.f32.mrb[7].mxu1 }
 0x258   :  { %v257_v26 = vpop.f32.mrb[0].mxu0 }
 0x259   :  { %v2905_v27 = vpop.f32.mrb[1].mxu0  ;;  %v266_v28 = vsel %vm168_vm2, %v257_v26, -inf }
 0x25a   :  { %v260_v29 = vpop.f32.mrb[2].mxu0  ;;  %267 = vmax.xlane.f32.xlu1 %v266_v28 }
 0x25b   :  { %v2906_v30 = vpop.f32.mrb[3].mxu0 }
 0x26b   :  { %287 = vrot.lane.b32.xlu1 %v3508_v12, %s3380_s16 }
 0x26f   :  { %336 = vrot.lane.b32.xlu1 %v3512_v16, %s3380_s16 }
 0x273   :  { %386 = vrot.lane.b32.xlu1 %v3508_v12, %s3381_s17 }
 0x2e3   :  { %v265_v31 = vpop.xlane.xlu1 %264 }
 0x2e4   :  { %v269_v32 = vsub.f32 %v209_v21, %v265_v31 }
 0x2e6   :  { %v271_v33 = vmul.f32 1.442695, %v269_v32 }
 0x2e7   :  { %v268_v34 = vpop.xlane.xlu1 %267 }
 0x2e8   :  { %3221 = vpow2.f32 %v271_v33  ;;  %v270_v35 = vsub.f32 %v257_v26, %v268_v34 }
 0x2ea   :  { %v273_v36 = vmul.f32 1.442695, %v270_v35 }
 0x2eb   :  { %v288_v37 = vpop.permute.xlu1 %287 }
 0x2ec   :  { %3223 = vpow2.f32 %v273_v36  ;;  %v294_v38 = vsel %vm292_vm3, %v288_v37, 0 }
 0x2ed   :  { %2908 = vmatpush3.bf16.msra.mxu1 %v294_v38 }
 0x2ee   :  { %2919 = vmatprep.subr.bf16.mxu1 %v3377_v0 }
 0x2ef   :  { %v337_v39 = vpop.permute.xlu1 %336 }
 0x2f0   :  { %v342_v40 = vsel %vm292_vm3, %v337_v39, 0 }
 0x2f1   :  { %2914 = vmatpush3.bf16.msra.mxu0 %v342_v40 }
 0x2f2   :  { %v3222_v41 = vpop.eup %3221  ;;  %2925 = vmatprep.subr.bf16.mxu0 %v3377_v0 }
 0x2f3   :  { %v275_v42 = vsel %vm168_vm2, %v3222_v41, 0.0  ;;  %v387_v45 = vpop.permute.xlu1 %386 }
 0x2f4   :  { %276 = vadd.xlane.f32.xlu0 %v275_v42  ;;  %v392_v52 = vsel %vm168_vm2, %v387_v45, 0 }
 0x2f6   :  { %v3224_v43 = vpop.eup %3223 }
 0x2f7   :  { %v278_v44 = vsel %vm168_vm2, %v3224_v43, 0.0 }
 0x2f8   :  { %279 = vadd.xlane.f32.xlu1 %v278_v44 }
 0x309   :  { %436 = vrot.lane.b32.xlu1 %v3512_v16, %s3381_s17 }
 0x30a   :  { %384 = vrot.lane.b32.xlu0 %v3508_v12, %s3382_s18 }
 0x30d   :  { %434 = vrot.lane.b32.xlu1 %v3512_v16, %s3382_s18 }
 0x381   :  { %v277_v46 = vpop.xlane.xlu0 %276 }
 0x382   :  { %3225 = vrcp.f32 %v277_v46 }
 0x385   :  { %v280_v47 = vpop.xlane.xlu1 %279  ;;  %v385_v57 = vpop.permute.xlu0 %384 }
 0x386   :  { %3227 = vrcp.f32 %v280_v47 }
 0x389   :  { %v437_v54 = vpop.permute.xlu1 %436 }
 0x38a   :  { %v442_v56 = vsel %vm168_vm2, %v437_v54, 0 }
 0x38c   :  { %v3226_v48 = vpop.eup %3225 }
 0x38d   :  { %v283_v49 = vmul.f32 %v3226_v48, %v3222_v41  ;;  %v435_v58 = vpop.permute.xlu1 %434 }
 0x38f   :  { %v285_v50 = vpack.c.bf16 %v283_v49, %v283_v49 }
 0x390   :  { %v3228_v51 = vpop.eup %3227 }
 0x391   :  { %v284_v53 = vmul.f32 %v3228_v51, %v3224_v43  ;;  %2910 = vmatmul.mubr.msk.bf16.vlgmr.msra.gmra.mrb[8].mxu1 %vm168_vm2, %v285_v50 }
 0x392   :  { %2920 = vmatpush3.bf16.xpose.msra.mxu1 %v392_v52  ;;  %2921 = vmatprep.mubr.msk.bf16.mxu1 %vm3378_vm0, %v3377_v0 }
 0x393   :  { %v286_v55 = vpack.c.bf16 %v284_v53, %v284_v53  ;;  %2931 = vmatprep.subr.bf16.mxu1 %v3377_v0 }
 0x395   :  { %2916 = vmatmul.mubr.msk.bf16.vlgmr.msra.gmra.mrb[4].mxu0 %vm168_vm2, %v286_v55 }
 0x396   :  { %2926 = vmatpush3.bf16.xpose.msra.mxu0 %v442_v56  ;;  %2927 = vmatprep.mubr.msk.bf16.mxu0 %vm3378_vm0, %v3377_v0 }
 0x397   :  { %2937 = vmatprep.subr.bf16.mxu0 %v3377_v0 }
 0x399   :  { %2922 = vmatmul.mubr.msk.bf16.vlgmr.msra.gmra.mrb[12].mxu1 %vm168_vm2, %v385_v57 }
 0x39a   :  { %2933 = vmatprep.mubr.msk.bf16.mxu1 %vm3378_vm0, %v3377_v0 }
 0x39d   :  { %2928 = vmatmul.mubr.msk.bf16.vlgmr.msra.gmra.mrb[8].mxu0 %vm168_vm2, %v435_v58 }
 0x39e   :  { %2939 = vmatprep.mubr.msk.bf16.mxu0 %vm3378_vm0, %v3377_v0 }
 0x464   :  { %v3564_v59 = vpop.f32.mrb[8].mxu1 }
 0x465   :  { %v2911_v60 = vpop.f32.mrb[9].mxu1 }
 0x466   :  { %v333_v61 = vpop.f32.mrb[10].mxu1 }
 0x467   :  { %v2912_v62 = vpop.f32.mrb[11].mxu1 }
 0x468   :  { %v3566_v63 = vpop.f32.mrb[4].mxu0 }
 0x469   :  { %v2917_v1 = vpop.f32.mrb[5].mxu0 }
 0x46a   :  { %v381_v2 = vpop.f32.mrb[6].mxu0 }
 0x46b   :  { %v2918_v3 = vpop.f32.mrb[7].mxu0 }
 0x46c   :  { %v428_v4 = vpop.f32.mrb[12].mxu1 }
 0x46d   :  { %v2923_v5 = vpop.f32.mrb[13].mxu1  ;;  %v484_v6 = vsel %vm168_vm2, %v428_v4, -inf }
 0x46e   :  { %485 = vmax.xlane.f32.xlu1 %v484_v6  ;;  %v431_v7 = vpop.f32.mrb[14].mxu1 }
 0x46f   :  { %v2924_v10 = vpop.f32.mrb[15].mxu1 }
 0x470   :  { %v478_v11 = vpop.f32.mrb[8].mxu0 }
 0x471   :  { %v2929_v13 = vpop.f32.mrb[9].mxu0  ;;  %v487_v14 = vsel %vm168_vm2, %v478_v11, -inf }
 0x472   :  { %488 = vmax.xlane.f32.xlu0 %v487_v14  ;;  %v481_v15 = vpop.f32.mrb[10].mxu0 }
 0x473   :  { %v2930_v17 = vpop.f32.mrb[11].mxu0 }
 0x47f   :  { %508 = vrot.lane.b32.xlu1 %v3508_v12, %s3383_s19 }
 0x483   :  { %606 = vrot.lane.b32.xlu1 %v3508_v12, %s3384_s20 }
 0x488   :  { %556 = vrot.lane.b32.xlu0 %v3512_v16, %s3383_s19 }
 0x48c   :  { %604 = vrot.lane.b32.xlu0 %v3508_v12, %s3385_s21 }
 0x4fb   :  { %v486_v18 = vpop.xlane.xlu1 %485 }
 0x4fc   :  { %v490_v19 = vsub.f32 %v428_v4, %v486_v18 }
 0x4fe   :  { %v492_v20 = vmul.f32 1.442695, %v490_v19 }
 0x4ff   :  { %v489_v21 = vpop.xlane.xlu0 %488  ;;  %v509_v22 = vpop.permute.xlu1 %508 }
 0x500   :  { %3229 = vpow2.f32 %v492_v20  ;;  %v491_v23 = vsub.f32 %v478_v11, %v489_v21  ;;  %v514_v24 = vsel %vm292_vm3, %v509_v22, 0 }
 0x501   :  { %2932 = vmatpush3.bf16.msra.mxu1 %v514_v24 }
 0x502   :  { %v494_v25 = vmul.f32 1.442695, %v491_v23  ;;  %2943 = vmatprep.subr.bf16.mxu1 %v3377_v0 }
 0x503   :  { %v557_v26 = vpop.permute.xlu0 %556  ;;  %v607_v32 = vpop.permute.xlu1 %606 }
 0x504   :  { %3231 = vpow2.f32 %v494_v25  ;;  %v562_v27 = vsel %vm292_vm3, %v557_v26, 0  ;;  %v612_v39 = vsel %vm168_vm2, %v607_v32, 0 }
 0x505   :  { %2938 = vmatpush3.bf16.msra.mxu0 %v562_v27 }
 0x506   :  { %2949 = vmatprep.subr.bf16.mxu0 %v3377_v0 }
 0x507   :  { %v605_v44 = vpop.permute.xlu0 %604 }
 0x50a   :  { %v3230_v28 = vpop.eup %3229 }
 0x50b   :  { %v496_v29 = vsel %vm168_vm2, %v3230_v28, 0.0 }
 0x50c   :  { %497 = vadd.xlane.f32.xlu1 %v496_v29 }
 0x50e   :  { %v3232_v30 = vpop.eup %3231 }
 0x50f   :  { %v499_v31 = vsel %vm168_vm2, %v3232_v30, 0.0 }
 0x510   :  { %500 = vadd.xlane.f32.xlu1 %v499_v31 }
 0x521   :  { %656 = vrot.lane.b32.xlu1 %v3512_v16, %s3384_s20 }
 0x525   :  { %654 = vrot.lane.b32.xlu1 %v3512_v16, %s3385_s21 }
 0x599   :  { %v498_v33 = vpop.xlane.xlu1 %497 }
 0x59a   :  { %3233 = vrcp.f32 %v498_v33 }
 0x59d   :  { %v501_v34 = vpop.xlane.xlu1 %500 }
 0x59e   :  { %3235 = vrcp.f32 %v501_v34 }
 0x5a1   :  { %v657_v41 = vpop.permute.xlu1 %656 }
 0x5a2   :  { %v662_v43 = vsel %vm168_vm2, %v657_v41, 0 }
 0x5a4   :  { %v3234_v35 = vpop.eup %3233 }
 0x5a5   :  { %v504_v36 = vmul.f32 %v3234_v35, %v3230_v28  ;;  %v655_v45 = vpop.permute.xlu1 %654 }
 0x5a7   :  { %v506_v37 = vpack.c.bf16 %v504_v36, %v504_v36 }
 0x5a8   :  { %v3236_v38 = vpop.eup %3235 }
 0x5a9   :  { %v505_v40 = vmul.f32 %v3236_v38, %v3232_v30  ;;  %2934 = vmatmul.mubr.msk.bf16.vlgmr.msra.gmra.mrb[16].mxu1 %vm168_vm2, %v506_v37 }
 0x5aa   :  { %2944 = vmatpush3.bf16.xpose.msra.mxu1 %v612_v39  ;;  %2945 = vmatprep.mubr.msk.bf16.mxu1 %vm3378_vm0, %v3377_v0 }
 0x5ab   :  { %v507_v42 = vpack.c.bf16 %v505_v40, %v505_v40  ;;  %2955 = vmatprep.subr.bf16.mxu1 %v3377_v0 }
 0x5ad   :  { %2940 = vmatmul.mubr.msk.bf16.vlgmr.msra.gmra.mrb[12].mxu0 %vm168_vm2, %v507_v42 }
 0x5ae   :  { %2950 = vmatpush3.bf16.xpose.msra.mxu0 %v662_v43  ;;  %2951 = vmatprep.mubr.msk.bf16.mxu0 %vm3378_vm0, %v3377_v0 }
 0x5af   :  { %2961 = vmatprep.subr.bf16.mxu0 %v3377_v0 }
 0x5b1   :  { %2946 = vmatmul.mubr.msk.bf16.vlgmr.msra.gmra.mrb[20].mxu1 %vm168_vm2, %v605_v44 }
 0x5b2   :  { %2957 = vmatprep.mubr.msk.bf16.mxu1 %vm3378_vm0, %v3377_v0 }
 0x5b5   :  { %2952 = vmatmul.mubr.msk.bf16.vlgmr.msra.gmra.mrb[16].mxu0 %vm168_vm2, %v655_v45 }
 0x5b6   :  { %2963 = vmatprep.mubr.msk.bf16.mxu0 %vm3378_vm0, %v3377_v0 }
 0x67c   :  { %v3604_v46 = vpop.f32.mrb[16].mxu1 }
 0x67d   :  { %v2935_v47 = vpop.f32.mrb[17].mxu1 }
 0x67e   :  { %v553_v48 = vpop.f32.mrb[18].mxu1 }
 0x67f   :  { %v2936_v49 = vpop.f32.mrb[19].mxu1 }
 0x680   :  { %v3606_v50 = vpop.f32.mrb[12].mxu0 }
 0x681   :  { %v3171_v51 = vpack.i.bf16 %v3606_v50, %v3604_v46  ;;  %v2941_v52 = vpop.f32.mrb[13].mxu0 }
 0x682   :  { %v601_v53 = vpop.f32.mrb[14].mxu0 }
 0x683   :  { %v2942_v54 = vpop.f32.mrb[15].mxu0 }
 0x684   :  { %v648_v55 = vpop.f32.mrb[20].mxu1 }
 0x685   :  { %v2947_v56 = vpop.f32.mrb[21].mxu1  ;;  %v704_v57 = vsel %vm168_vm2, %v648_v55, -inf }
 0x686   :  { %705 = vmax.xlane.f32.xlu0 %v704_v57  ;;  %v651_v58 = vpop.f32.mrb[22].mxu1 }
 0x687   :  { %v2948_v60 = vpop.f32.mrb[23].mxu1 }
 0x688   :  { %v698_v61 = vpop.f32.mrb[16].mxu0 }
 0x689   :  { %v2953_v62 = vpop.f32.mrb[17].mxu0  ;;  %v707_v1 = vsel %vm168_vm2, %v698_v61, -inf }
 0x68a   :  { %708 = vmax.xlane.f32.xlu1 %v707_v1  ;;  %v701_v2 = vpop.f32.mrb[18].mxu0 }
 0x68b   :  { %v2954_v3 = vpop.f32.mrb[19].mxu0 }
 0x69b   :  { %728 = vrot.lane.b32.xlu1 %v3508_v12, %s3386_s23 }
 0x69f   :  { %826 = vrot.lane.b32.xlu1 %v3508_v12, %s3387_s24 }
 0x6a3   :  { %876 = vrot.lane.b32.xlu1 %v3512_v16, %s3387_s24 }
 0x6a7   :  { %874 = vrot.lane.b32.xlu1 %v3512_v16, %s3388_s25 }
 0x713   :  { %v706_v4 = vpop.xlane.xlu0 %705 }
 0x714   :  { %v710_v5 = vsub.f32 %v648_v55, %v706_v4 }
 0x716   :  { %v712_v6 = vmul.f32 1.442695, %v710_v5 }
 0x717   :  { %v709_v7 = vpop.xlane.xlu1 %708 }
 0x718   :  { %3237 = vpow2.f32 %v712_v6  ;;  %v711_v10 = vsub.f32 %v698_v61, %v709_v7 }
 0x71a   :  { %v714_v11 = vmul.f32 1.442695, %v711_v10 }
 0x71b   :  { %v729_v13 = vpop.permute.xlu1 %728 }
 0x71c   :  { %3239 = vpow2.f32 %v714_v11  ;;  %v734_v14 = vsel %vm292_vm3, %v729_v13, 0 }
 0x71d   :  { %2956 = vmatpush3.bf16.msra.mxu1 %v734_v14 }
 0x71e   :  { %2967 = vmatprep.subr.bf16.mxu1 %v3377_v0 }
 0x71f   :  { %v827_v25 = vpop.permute.xlu1 %826 }
 0x720   :  { %v832_v29 = vsel %vm168_vm2, %v827_v25, 0 }
 0x722   :  { %v3238_v15 = vpop.eup %3237 }
 0x723   :  { %v716_v17 = vsel %vm168_vm2, %v3238_v15, 0.0  ;;  %v877_v31 = vpop.permute.xlu1 %876 }
 0x724   :  { %717 = vadd.xlane.f32.xlu0 %v716_v17  ;;  %v882_v33 = vsel %vm168_vm2, %v877_v31, 0 }
 0x726   :  { %v3240_v18 = vpop.eup %3239 }
 0x727   :  { %v719_v19 = vsel %vm168_vm2, %v3240_v18, 0.0  ;;  %v875_v35 = vpop.permute.xlu1 %874 }
 0x728   :  { %720 = vadd.xlane.f32.xlu0 %v719_v19  ;;  %v3204_v19 = vld [vmem:[%s4017_s3 + $0x8] sm:$0xff]  }
 0x73e   :  { %776 = vrot.lane.b32.xlu0 %v3512_v16, %s3386_s23 }
 0x742   :  { %824 = vrot.lane.b32.xlu0 %v3508_v12, %s3388_s25 }
 0x7b1   :  { %v718_v20 = vpop.xlane.xlu0 %717 }
 0x7b2   :  { %3241 = vrcp.f32 %v718_v20 }
 0x7b5   :  { %v721_v21 = vpop.xlane.xlu0 %720 }
 0x7b6   :  { %3243 = vrcp.f32 %v721_v21 }
 0x7b9   :  { %v777_v22 = vpop.permute.xlu0 %776 }
 0x7ba   :  { %v782_v23 = vsel %vm292_vm3, %v777_v22, 0 }
 0x7bb   :  { %2962 = vmatpush3.bf16.msra.mxu0 %v782_v23 }
 0x7bc   :  { %v3242_v24 = vpop.eup %3241  ;;  %2973 = vmatprep.subr.bf16.mxu0 %v3377_v0 }
 0x7bd   :  { %v724_v26 = vmul.f32 %v3242_v24, %v3238_v15  ;;  %v825_v34 = vpop.permute.xlu0 %824 }
 0x7bf   :  { %v726_v27 = vpack.c.bf16 %v724_v26, %v724_v26 }
 0x7c0   :  { %v3244_v28 = vpop.eup %3243 }
 0x7c1   :  { %v725_v30 = vmul.f32 %v3244_v28, %v3240_v18  ;;  %2958 = vmatmul.mubr.msk.bf16.vlgmr.msra.gmra.mrb[24].mxu1 %vm168_vm2, %v726_v27  ;;  %v3203_v18 = vld [vmem:[%s4017_s3] sm:$0xff]  }
 0x7c2   :  { %2968 = vmatpush3.bf16.xpose.msra.mxu1 %v832_v29  ;;  %2969 = vmatprep.mubr.msk.bf16.mxu1 %vm3378_vm0, %v3377_v0 }
 0x7c3   :  { %v727_v32 = vpack.c.bf16 %v725_v30, %v725_v30  ;;  %2979 = vmatprep.subr.bf16.mxu1 %v3377_v0 }
 0x7c5   :  { %2964 = vmatmul.mubr.msk.bf16.vlgmr.msra.gmra.mrb[20].mxu0 %vm168_vm2, %v727_v32 }
 0x7c6   :  { %2974 = vmatpush3.bf16.xpose.msra.mxu0 %v882_v33  ;;  %2975 = vmatprep.mubr.msk.bf16.mxu0 %vm3378_vm0, %v3377_v0 }
 0x7c7   :  { %2985 = vmatprep.subr.bf16.mxu0 %v3377_v0 }
 0x7c9   :  { %2970 = vmatmul.mubr.msk.bf16.vlgmr.msra.gmra.mrb[28].mxu1 %vm168_vm2, %v825_v34 }
 0x7ca   :  { %2981 = vmatprep.mubr.msk.bf16.mxu1 %vm3378_vm0, %v3377_v0 }
 0x7cd   :  { %2976 = vmatmul.mubr.msk.bf16.vlgmr.msra.gmra.mrb[24].mxu0 %vm168_vm2, %v875_v35 }
 0x7ce   :  { %2987 = vmatprep.mubr.msk.bf16.mxu0 %vm3378_vm0, %v3377_v0 }
 0x894   :  { %v770_v36 = vpop.f32.mrb[24].mxu1 }
 0x895   :  { %v2959_v37 = vpop.f32.mrb[25].mxu1 }
 0x896   :  { %v773_v38 = vpop.f32.mrb[26].mxu1 }
 0x897   :  { %v2960_v39 = vpop.f32.mrb[27].mxu1 }
 0x898   :  { %v818_v40 = vpop.f32.mrb[20].mxu0 }
 0x899   :  { %v3176_v41 = vpack.i.bf16 %v818_v40, %v770_v36  ;;  %v2965_v42 = vpop.f32.mrb[21].mxu0 }
 0x89a   :  { %v821_v43 = vpop.f32.mrb[22].mxu0 }
 0x89b   :  { %v2966_v44 = vpop.f32.mrb[23].mxu0 }
 0x89c   :  { %v868_v45 = vpop.f32.mrb[28].mxu1 }
 0x89d   :  { %v2971_v47 = vpop.f32.mrb[29].mxu1  ;;  %v924_v48 = vsel %vm168_vm2, %v868_v45, -inf }
 0x89e   :  { %925 = vmax.xlane.f32.xlu0 %v924_v48  ;;  %v871_v49 = vpop.f32.mrb[30].mxu1 }
 0x89f   :  { %v2972_v52 = vpop.f32.mrb[31].mxu1 }
 0x8a0   :  { %v918_v53 = vpop.f32.mrb[24].mxu0 }
 0x8a1   :  { %v2977_v54 = vpop.f32.mrb[25].mxu0  ;;  %v927_v55 = vsel %vm168_vm2, %v918_v53, -inf }
 0x8a2   :  { %928 = vmax.xlane.f32.xlu1 %v927_v55  ;;  %v921_v56 = vpop.f32.mrb[26].mxu0 }
 0x8a3   :  { %v2978_v57 = vpop.f32.mrb[27].mxu0 }
 0x8b3   :  { %948 = vrot.lane.b32.xlu1 %v3508_v12, %s3389_s26 }
 0x8b7   :  { %3172 = vrot.lane.b32.xlu1 %v3171_v51, %s3375_s14 }
 0x8bb   :  { %3177 = vrot.lane.b32.xlu1 %v3176_v41, %s4029_s27 }
 0x92b   :  { %v926_v58 = vpop.xlane.xlu0 %925 }
 0x92c   :  { %v930_v60 = vsub.f32 %v868_v45, %v926_v58  ;;  %v3207_v58 = vld [vmem:[%s4022_s8] sm:$0xff]  }
 0x92e   :  { %v932_v61 = vmul.f32 1.442695, %v930_v60  ;;  %v3208_v60 = vld [vmem:[%s4022_s8 + $0x8] sm:$0xff]  }
 0x92f   :  { %v929_v62 = vpop.xlane.xlu1 %928 }
 0x930   :  { %3245 = vpow2.f32 %v932_v61  ;;  %v931_v1 = vsub.f32 %v918_v53, %v929_v62 }
 0x932   :  { %v934_v2 = vmul.f32 1.442695, %v931_v1 }
 0x933   :  { %v949_v3 = vpop.permute.xlu1 %948 }
 0x934   :  { %3247 = vpow2.f32 %v934_v2  ;;  %v954_v4 = vsel %vm292_vm3, %v949_v3, 0 }
 0x935   :  { %2980 = vmatpush3.bf16.msra.mxu1 %v954_v4 }
 0x936   :  { %2991 = vmatprep.subr.bf16.mxu1 %v3377_v0 }
 0x937   :  { %v3173_v29 = vpop.permute.xlu1 %3172 }
 0x938   :  { %v3175_v31 = vunpack.i.h.bf16 %v3173_v29  ;;  %v3174_v32 = vunpack.i.l.bf16 %v3173_v29 }
 0x93a   :  { %v3246_v12 = vpop.eup %3245  ;;  %v1069_v36 = vsel %vm168_vm2, %v3566_v63, %v3175_v31  ;;  %v1068_v37 = vsel %vm168_vm2, %v3564_v59, %v3174_v32 }
 0x93b   :  { %v936_v46 = vsel %vm168_vm2, %v3246_v12, 0.0  ;;  %v3178_v30 = vpop.permute.xlu1 %3177 }
 0x93c   :  { %937 = vadd.xlane.f32.xlu0 %v936_v46  ;;  %v3180_v33 = vunpack.i.h.bf16 %v3178_v30  ;;  %v3179_v34 = vunpack.i.l.bf16 %v3178_v30 }
 0x93e   :  { %v3248_v50 = vpop.eup %3247  ;;  %v1072_v40 = vsel %vm1070_vm4, %v1069_v36, %v3180_v33  ;;  %v1071_v41 = vsel %vm1070_vm4, %v1068_v37, %v3179_v34  ;;  %v2719_v37 = vld [vmem:[%s4023_s9] ss:$0 sm:$0xff] }
 0x93f   :  { %v939_v51 = vsel %vm168_vm2, %v3248_v50, 0.0 }
 0x940   :  { %940 = vadd.xlane.f32.xlu0 %v939_v51 }
 0x956   :  { %996 = vrot.lane.b32.xlu0 %v3512_v16, %s3389_s26 }
 0x9c9   :  { %v938_v5 = vpop.xlane.xlu0 %937 }
 0x9ca   :  { %3249 = vrcp.f32 %v938_v5 }
 0x9cd   :  { %v941_v6 = vpop.xlane.xlu0 %940 }
 0x9ce   :  { %3251 = vrcp.f32 %v941_v6 }
 0x9d1   :  { %v997_v7 = vpop.permute.xlu0 %996 }
 0x9d2   :  { %v1002_v10 = vsel %vm292_vm3, %v997_v7, 0 }
 0x9d3   :  { %2986 = vmatpush3.bf16.msra.mxu0 %v1002_v10 }
 0x9d4   :  { %v3250_v11 = vpop.eup %3249  ;;  %2999 = vmatprep.subr.bf16.mxu0 %v3377_v0 }
 0x9d5   :  { %v944_v13 = vmul.f32 %v3250_v11, %v3246_v12 }
 0x9d7   :  { %v946_v14 = vpack.c.bf16 %v944_v13, %v944_v13 }
 0x9d8   :  { %v3252_v15 = vpop.eup %3251 }
 0x9d9   :  { %v945_v17 = vmul.f32 %v3252_v15, %v3248_v50  ;;  %2982 = vmatmul.mubr.msk.bf16.vlgmr.msra.gmra.mrb[32].mxu1 %vm168_vm2, %v946_v14  ;;  %v2713_v14 = vld [vmem:[%s4018_s4] ss:$0 sm:$0xff] }
 0x9da   :  { %2995 = vmatprep.mubr.msk.bf16.mxu1 %vm3378_vm0, %v3377_v0  ;;  %2992 = vmatpush3.bf16.msra.mxu1 %v3203_v18 }
 0x9db   :  { %v947_v16 = vpack.c.bf16 %v945_v17, %v945_v17  ;;  %2993 = vmatprep.subr.bf16.mxu1 %v3377_v0 }
 0x9dd   :  { %2988 = vmatmul.mubr.msk.bf16.vlgmr.msra.gmra.mrb[28].mxu0 %vm168_vm2, %v947_v16 }
 0x9de   :  { %3003 = vmatprep.mubr.msk.bf16.mxu0 %vm3378_vm0, %v3377_v0  ;;  %2994 = vmatpush3.bf16.msra.mxu1 %v3204_v19 }
 0x9df   :  { %3007 = vmatprep.subr.bf16.mxu1 %v3377_v0 }
 0xaac   :  { %v990_v20 = vpop.f32.mrb[32].mxu1 }
 0xaad   :  { %v2983_v21 = vpop.f32.mrb[33].mxu1 }
 0xaae   :  { %v993_v22 = vpop.f32.mrb[34].mxu1 }
 0xaaf   :  { %v2984_v23 = vpop.f32.mrb[35].mxu1 }
 0xab0   :  { %v1038_v24 = vpop.f32.mrb[28].mxu0 }
 0xab1   :  { %v3181_v25 = vpack.i.bf16 %v1038_v24, %v990_v20  ;;  %v2989_v26 = vpop.f32.mrb[29].mxu0  ;;  %v2714_v20 = vld [vmem:[%s4019_s5] ss:$0 sm:$0xff] }
 0xab2   :  { %v1041_v27 = vpop.f32.mrb[30].mxu0  ;;  %v3210_v26 = vld [vmem:[%s4022_s8 + $0x18] sm:$0xff]  }
 0xab3   :  { %v2990_v28 = vpop.f32.mrb[31].mxu0  ;;  %3182 = vrot.lane.b32.xlu0 %v3181_v25, %s4028_s1  ;;  %v3209_v25 = vld [vmem:[%s4022_s8 + $0x10] sm:$0xff]   ;;  %v2715_v27 = vld [vmem:[%s4021_s7] ss:$0 sm:$0xff] }
 0xb25   :  { %v3183_v35 = vpop.permute.xlu0 %3182 }
 0xb26   :  { %v3185_v38 = vunpack.i.h.bf16 %v3183_v35  ;;  %v3184_v39 = vunpack.i.l.bf16 %v3183_v35 }
 0xb28   :  { %v1075_v42 = vsel %vm1073_vm5, %v1072_v40, %v3185_v38  ;;  %v1074_v43 = vsel %vm1073_vm5, %v1071_v41, %v3184_v39 }
 0xb29   :  { %v1076_v44 = vpack.c.bf16 %v1075_v42, %v1074_v43 }
 0xb2b   :  { %2996 = vmatmul.mubr.msk.bf16.vlgmr.msra.gmra.mrb[36].mxu1 %vm115_vm1, %v1076_v44 }
 0xb2c   :  { %3015 = vmatprep.mubr.msk.bf16.mxu1 %vm3378_vm0, %v3377_v0  ;;  %3008 = vmatpush3.bf16.msra.mxu1 %v3207_v58 }
 0xb2d   :  { %3009 = vmatprep.subr.bf16.mxu1 %v3377_v0 }
 0xb30   :  { %3010 = vmatpush3.bf16.msra.mxu1 %v3208_v60 }
 0xb31   :  { %3011 = vmatprep.subr.bf16.mxu1 %v3377_v0 }
 0xb34   :  { %3012 = vmatpush3.bf16.msra.mxu1 %v3209_v25 }
 0xb35   :  { %3013 = vmatprep.subr.bf16.mxu1 %v3377_v0 }
 0xb38   :  { %3014 = vmatpush3.bf16.msra.mxu1 %v3210_v26 }
 0xb39   :  { %3033 = vmatprep.subr.bf16.mxu1 %v3377_v0 }
 0xbfe   :  { %v1126_v63 = vpop.f32.mrb[36].mxu1 }
 0xbff   :  { %v1133_v45 = vadd.f32 %v1126_v63, %v3498_v8  ;;  %v2997_v59 = vpop.f32.mrb[37].mxu1  ;;  %v3205_v8 = vld [vmem:[%s4020_s6] sm:$0xff]  }
 0xc00   :  { %v1129_v47 = vpop.f32.mrb[38].mxu1  ;;  %3000 = vmatpush3.bf16.msra.mxu0 %v3205_v8 }
 0xc01   :  { %v1134_v48 = vadd.f32 %v1129_v47, %v3500_v9  ;;  %v2998_v49 = vpop.f32.mrb[39].mxu1  ;;  %v1135_v52 = vsel %vm115_vm1, %v1133_v45, 0.0  ;;  %v1144_v55 = vmul.f32 %v1133_v45, %v1133_v45  ;;  %v3206_v9 = vld [vmem:[%s4020_s6 + $0x8] sm:$0xff]   ;;  %3001 = vmatprep.subr.bf16.mxu0 %v3377_v0 }
 0xc02   :  { %1136 = vadd.xlane.f32.xlu1 %v1135_v52 }
 0xc03   :  { %v1138_v53 = vsel %vm115_vm1, %v1134_v48, 0.0  ;;  %v1145_v54 = vmul.f32 %v1134_v48, %v1134_v48  ;;  %v1146_v57 = vsel %vm115_vm1, %v1144_v55, 0.0 }
 0xc04   :  { %1139 = vadd.xlane.f32.xlu0 %v1138_v53  ;;  %3002 = vmatpush3.bf16.msra.mxu0 %v3206_v9  ;;  %v3211_v53 = vld [vmem:[%s4016_s2 + $0x10] sm:$0xff]  }
 0xc05   :  { %v1149_v56 = vsel %vm115_vm1, %v1145_v54, 0.0  ;;  %3019 = vmatprep.subr.bf16.mxu0 %v3377_v0  ;;  %v3212_v54 = vld [vmem:[%s4016_s2 + $0x18] sm:$0xff]  }
 0xc06   :  { %1150 = vadd.xlane.f32.xlu1 %v1149_v56 }
 0xc08   :  { %1147 = vadd.xlane.f32.xlu0 %v1146_v57 }
 0xc8f   :  { %v1137_v61 = vpop.xlane.xlu1 %1136 }
 0xc90   :  { %v1142_v1 = vmul.f32 0.03125, %v1137_v61 }
 0xc91   :  { %v1140_v62 = vpop.xlane.xlu0 %1139 }
 0xc92   :  { %v1143_v2 = vmul.f32 0.03125, %v1140_v62  ;;  %v1154_v50 = vmul.f32 %v1142_v1, %v1142_v1  ;;  %v1158_v15 = vsub.f32 %v1133_v45, %v1142_v1 }
 0xc93   :  { %v1151_v3 = vpop.xlane.xlu1 %1150 }
 0xc94   :  { %v1155_v4 = vmul.f32 %v1143_v2, %v1143_v2  ;;  %v1153_v12 = vmul.f32 0.03125, %v1151_v3  ;;  %v1159_v11 = vsub.f32 %v1134_v48, %v1143_v2 }
 0xc95   :  { %v1148_v46 = vpop.xlane.xlu0 %1147 }
 0xc96   :  { %v1157_v51 = vsub.f32 %v1153_v12, %v1155_v4  ;;  %v1152_v5 = vmul.f32 0.03125, %v1148_v46 }
 0xc98   :  { %v1161_v6 = vadd.f32 1e-05, %v1157_v51  ;;  %v1156_v7 = vsub.f32 %v1152_v5, %v1154_v50  ;;  %v2725_v51 = vld [vmem:[%s4024_s10] ss:$0 sm:$0xff] }
 0xc9a   :  { %3253 = vrsqrt.f32 %v1161_v6  ;;  %v1160_v10 = vadd.f32 1e-05, %v1156_v7 }
 0xc9c   :  { %3255 = vrsqrt.f32 %v1160_v10 }
 0xca4   :  { %v3254_v13 = vpop.eup %3253 }
 0xca5   :  { %v1165_v17 = vmul.f32 %v3254_v13, %v1159_v11  ;;  %v2726_v13 = vld [vmem:[%s4025_s11] ss:$0 sm:$0xff] }
 0xca6   :  { %v3256_v16 = vpop.eup %3255 }
 0xca7   :  { %v1164_v18 = vmul.f32 %v3256_v16, %v1158_v15  ;;  %v1173_v19 = vmul.f32 %v2713_v14, %v1165_v17 }
 0xca9   :  { %v1172_v21 = vmul.f32 %v2713_v14, %v1164_v18  ;;  %v1181_v23 = vadd.f32 %v2714_v20, %v1173_v19 }
 0xcab   :  { %v1180_v22 = vadd.f32 %v2714_v20, %v1172_v21 }
 0xcad   :  { %v1182_v24 = vpack.c.bf16 %v1181_v23, %v1180_v22 }
 0xcaf   :  { %3004 = vmatmul.mubr.msk.bf16.vlgmr.msra.gmra.mrb[32].mxu0 %vm115_vm1, %v1182_v24 }
 0xcb0   :  { %3023 = vmatprep.mubr.msk.bf16.mxu0 %vm3378_vm0, %v3377_v0  ;;  %3020 = vmatpush3.bf16.msra.mxu0 %v3211_v53 }
 0xcb1   :  { %3021 = vmatprep.subr.bf16.mxu0 %v3377_v0 }
 0xcb4   :  { %3022 = vmatpush3.bf16.msra.mxu0 %v3212_v54 }
 0xcb5   :  { %3027 = vmatprep.subr.bf16.mxu0 %v3377_v0 }
 0xd82   :  { %v1238_v28 = vpop.f32.mrb[32].mxu0 }
 0xd83   :  { %v1239_v29 = vadd.f32 %v2715_v27, %v1238_v28  ;;  %v3005_v30 = vpop.f32.mrb[33].mxu0 }
 0xd84   :  { %v1241_v31 = vpop.f32.mrb[34].mxu0 }
 0xd85   :  { %v1242_v32 = vadd.f32 %v2715_v27, %v1241_v31  ;;  %v3006_v33 = vpop.f32.mrb[35].mxu0  ;;  %v1245_v34 = vmax.f32 %v1239_v29, 0.0 }
 0xd87   :  { %v1246_v35 = vmax.f32 %v1242_v32, 0.0 }
 0xd89   :  { %v1247_v36 = vpack.c.bf16 %v1246_v35, %v1245_v34 }
 0xd8b   :  { %3016 = vmatmul.mubr.msk.bf16.vlgmr.msra.gmra.mrb[40].mxu1 %vm1278_vm6, %v1247_v36 }
 0xd8c   :  { %3035 = vmatprep.mubr.msk.bf16.mxu1 %vm3378_vm0, %v3377_v0 }
 0xe5e   :  { %v1316_v38 = vpop.f32.mrb[40].mxu1 }
 0xe5f   :  { %v1317_v39 = vadd.f32 %v2719_v37, %v1316_v38  ;;  %v3017_v40 = vpop.f32.mrb[41].mxu1 }
 0xe60   :  { %v1319_v41 = vpop.f32.mrb[42].mxu1 }
 0xe61   :  { %v1323_v42 = vadd.f32 %v1317_v39, %v1180_v22  ;;  %v1320_v43 = vadd.f32 %v2719_v37, %v1319_v41  ;;  %v3018_v44 = vpop.f32.mrb[43].mxu1 }
 0xe63   :  { %v1324_v63 = vadd.f32 %v1320_v43, %v1181_v23  ;;  %v1325_v45 = vsel %vm115_vm1, %v1323_v42, 0.0  ;;  %v1333_v59 = vmul.f32 %v1323_v42, %v1323_v42 }
 0xe64   :  { %1326 = vadd.xlane.f32.xlu0 %v1325_v45 }
 0xe65   :  { %v1328_v47 = vsel %vm115_vm1, %v1324_v63, 0.0  ;;  %v1334_v48 = vmul.f32 %v1324_v63, %v1324_v63  ;;  %v1335_v49 = vsel %vm115_vm1, %v1333_v59, 0.0 }
 0xe66   :  { %1329 = vadd.xlane.f32.xlu1 %v1328_v47 }
 0xe67   :  { %v1338_v52 = vsel %vm115_vm1, %v1334_v48, 0.0 }
 0xe68   :  { %1336 = vadd.xlane.f32.xlu0 %v1335_v49 }
 0xe6a   :  { %1339 = vadd.xlane.f32.xlu1 %v1338_v52 }
 0xef1   :  { %v1327_v55 = vpop.xlane.xlu0 %1326 }
 0xef2   :  { %v1331_v56 = vmul.f32 0.03125, %v1327_v55 }
 0xef3   :  { %v1330_v57 = vpop.xlane.xlu1 %1329 }
 0xef4   :  { %v1332_v8 = vmul.f32 0.03125, %v1330_v57  ;;  %v1343_v58 = vmul.f32 %v1331_v56, %v1331_v56  ;;  %v1347_v46 = vsub.f32 %v1323_v42, %v1331_v56 }
 0xef5   :  { %v1337_v9 = vpop.xlane.xlu0 %1336 }
 0xef6   :  { %v1341_v60 = vmul.f32 0.03125, %v1337_v9  ;;  %v1344_v62 = vmul.f32 %v1332_v8, %v1332_v8  ;;  %v1348_v5 = vsub.f32 %v1324_v63, %v1332_v8 }
 0xef7   :  { %v1340_v61 = vpop.xlane.xlu1 %1339 }
 0xef8   :  { %v1345_v1 = vsub.f32 %v1341_v60, %v1343_v58  ;;  %v1342_v2 = vmul.f32 0.03125, %v1340_v61 }
 0xefa   :  { %v1349_v3 = vadd.f32 1e-05, %v1345_v1  ;;  %v1346_v4 = vsub.f32 %v1342_v2, %v1344_v62 }
 0xefc   :  { %3257 = vrsqrt.f32 %v1349_v3  ;;  %v1350_v12 = vadd.f32 1e-05, %v1346_v4 }
 0xefe   :  { %3259 = vrsqrt.f32 %v1350_v12 }
 0xf06   :  { %v3258_v50 = vpop.eup %3257 }
 0xf07   :  { %v1353_v6 = vmul.f32 %v3258_v50, %v1347_v46 }
 0xf08   :  { %v3260_v7 = vpop.eup %3259 }
 0xf09   :  { %v1354_v10 = vmul.f32 %v3260_v7, %v1348_v5  ;;  %v1361_v11 = vmul.f32 %v2725_v51, %v1353_v6 }
 0xf0b   :  { %v1362_v14 = vmul.f32 %v2725_v51, %v1354_v10  ;;  %v3755_v15 = vadd.f32 %v2726_v13, %v1361_v11 }
 0xf0d   :  { %v3757_v17 = vadd.f32 %v2726_v13, %v1362_v14 }
 0xf0f   :  { %v1407_v16 = vpack.c.bf16 %v3757_v17, %v3755_v15 }
 0xf11   :  { %3024 = vmatmul.mubr.msk.bf16.vlgmr.msra.gmra.mrb[36].mxu0 %vm115_vm1, %v1407_v16 }
 0xf12   :  { %3029 = vmatprep.mubr.msk.bf16.mxu0 %vm3378_vm0, %v3377_v0 }
 0xfe4   :  { %v1457_v18 = vpop.f32.mrb[36].mxu0 }
 0xfe5   :  { %v3764_v19 = vpack.c.bf16 %v1457_v18, %v1457_v18  ;;  %v3025_v20 = vpop.f32.mrb[37].mxu0 }
 0xfe6   :  { %v1460_v21 = vpop.f32.mrb[38].mxu0 }
 0xfe7   :  { %v3766_v22 = vpack.c.bf16 %v1460_v21, %v1460_v21  ;;  %1470 = vrot.lane.b32.xlu0 %v3764_v19, %s3379_s15  ;;  %v3026_v23 = vpop.f32.mrb[39].mxu0 }
 0xfe9   :  { %1518 = vrot.lane.b32.xlu1 %v3766_v22, %s3379_s15  ;;  %s4030_s15 = smov 16  }
0x1059   :  { %v1471_v24 = vpop.permute.xlu0 %1470 }
0x105a   :  { %v1476_v25 = vsel %vm168_vm2, %v1471_v24, 0 }
0x105b   :  { %3028 = vmatpush3.bf16.xpose.msra.mxu0 %v1476_v25  ;;  %v1519_v26 = vpop.permute.xlu1 %1518 }
0x105c   :  { %v1524_v27 = vsel %vm168_vm2, %v1519_v26, 0  ;;  %3039 = vmatprep.subr.bf16.mxu0 %v3377_v0 }
0x105d   :  { %3034 = vmatpush3.bf16.xpose.msra.mxu1 %v1524_v27 }
0x105e   :  { %3045 = vmatprep.subr.bf16.mxu1 %v3377_v0 }
0x1062   :  { %3030 = vmatmul.mubr.msk.bf16.vlgmr.msra.gmra.mrb[40].mxu0 %vm168_vm2, %v3764_v19 }
0x1063   :  { %3041 = vmatprep.mubr.msk.bf16.mxu0 %vm3378_vm0, %v3377_v0 }
0x1064   :  { %3036 = vmatmul.mubr.msk.bf16.vlgmr.msra.gmra.mrb[44].mxu1 %vm168_vm2, %v3766_v22 }
0x1065   :  { %3047 = vmatprep.mubr.msk.bf16.mxu1 %vm3378_vm0, %v3377_v0 }
0x1135   :  { %v1512_v28 = vpop.f32.mrb[40].mxu0 }
0x1136   :  { %v3031_v29 = vpop.f32.mrb[41].mxu0  ;;  %v1566_v30 = vsel %vm168_vm2, %v1512_v28, -inf }
0x1137   :  { %1567 = vmax.xlane.f32.xlu1 %v1566_v30  ;;  %v1515_v31 = vpop.f32.mrb[42].mxu0  ;;  %v1560_v32 = vpop.f32.mrb[44].mxu1 }
0x1138   :  { %v3032_v33 = vpop.f32.mrb[43].mxu0  ;;  %v3037_v34 = vpop.f32.mrb[45].mxu1  ;;  %v1569_v35 = vsel %vm168_vm2, %v1560_v32, -inf }
0x1139   :  { %1570 = vmax.xlane.f32.xlu0 %v1569_v35  ;;  %v1563_v36 = vpop.f32.mrb[46].mxu1 }
0x113a   :  { %v3038_v37 = vpop.f32.mrb[47].mxu1 }
0x1148   :  { %1638 = vrot.lane.b32.xlu1 %v3766_v22, %s3380_s16 }
0x114f   :  { %1590 = vrot.lane.b32.xlu0 %v3764_v19, %s3380_s16 }
0x11c4   :  { %v1568_v38 = vpop.xlane.xlu1 %1567 }
0x11c5   :  { %v1572_v39 = vsub.f32 %v1512_v28, %v1568_v38 }
0x11c6   :  { %v1571_v40 = vpop.xlane.xlu0 %1570 }
0x11c7   :  { %v1574_v41 = vmul.f32 1.442695, %v1572_v39  ;;  %v1573_v42 = vsub.f32 %v1560_v32, %v1571_v40 }
0x11c8   :  { %v1639_v43 = vpop.permute.xlu1 %1638 }
0x11c9   :  { %3261 = vpow2.f32 %v1574_v41  ;;  %v1576_v44 = vmul.f32 1.442695, %v1573_v42  ;;  %v1644_v63 = vsel %vm292_vm3, %v1639_v43, 0 }
0x11ca   :  { %3046 = vmatpush3.bf16.msra.mxu1 %v1644_v63  ;;  %v1591_v45 = vpop.permute.xlu0 %1590 }
0x11cb   :  { %3263 = vpow2.f32 %v1576_v44  ;;  %v1596_v59 = vsel %vm292_vm3, %v1591_v45, 0  ;;  %3057 = vmatprep.subr.bf16.mxu1 %v3377_v0 }
0x11cc   :  { %3040 = vmatpush3.bf16.msra.mxu0 %v1596_v59 }
0x11cd   :  { %3051 = vmatprep.subr.bf16.mxu0 %v3377_v0 }
0x11d3   :  { %v3262_v47 = vpop.eup %3261 }
0x11d4   :  { %v1578_v48 = vsel %vm168_vm2, %v3262_v47, 0.0 }
0x11d5   :  { %v3264_v49 = vpop.eup %3263  ;;  %1579 = vadd.xlane.f32.xlu0 %v1578_v48 }
0x11d6   :  { %v1581_v52 = vsel %vm168_vm2, %v3264_v49, 0.0 }
0x11d7   :  { %1582 = vadd.xlane.f32.xlu1 %v1581_v52 }
0x11e8   :  { %1688 = vrot.lane.b32.xlu1 %v3764_v19, %s3381_s17 }
0x11eb   :  { %1738 = vrot.lane.b32.xlu0 %v3766_v22, %s3381_s17 }
0x11ec   :  { %1686 = vrot.lane.b32.xlu1 %v3764_v19, %s3382_s18 }
0x11ef   :  { %1736 = vrot.lane.b32.xlu0 %v3766_v22, %s3382_s18  ;;  %s3392_s18 = smov [#allocation7]  }
0x1262   :  { %v1580_v53 = vpop.xlane.xlu0 %1579 }
0x1263   :  { %3265 = vrcp.f32 %v1580_v53 }
0x1264   :  { %v1583_v54 = vpop.xlane.xlu1 %1582 }
0x1265   :  { %3267 = vrcp.f32 %v1583_v54 }
0x1266   :  { %v1739_v60 = vpop.permute.xlu0 %1738 }
0x1267   :  { %v1744_v1 = vsel %vm168_vm2, %v1739_v60, 0 }
0x1268   :  { %v1689_v8 = vpop.permute.xlu1 %1688 }
0x1269   :  { %v1694_v61 = vsel %vm168_vm2, %v1689_v8, 0 }
0x126a   :  { %v1737_v3 = vpop.permute.xlu0 %1736 }
0x126c   :  { %v1687_v2 = vpop.permute.xlu1 %1686 }
0x126d   :  { %v3266_v55 = vpop.eup %3265 }
0x126e   :  { %v1586_v56 = vmul.f32 %v3266_v55, %v3262_v47 }
0x126f   :  { %v3268_v57 = vpop.eup %3267 }
0x1270   :  { %v1587_v9 = vmul.f32 %v3268_v57, %v3264_v49  ;;  %v1588_v58 = vpack.c.bf16 %v1586_v56, %v1586_v56 }
0x1272   :  { %3042 = vmatmul.mubr.msk.bf16.vlgmr.msra.gmra.mrb[44].mxu0 %vm168_vm2, %v1588_v58  ;;  %v1589_v62 = vpack.c.bf16 %v1587_v9, %v1587_v9 }
0x1273   :  { %3052 = vmatpush3.bf16.xpose.msra.mxu0 %v1694_v61  ;;  %3053 = vmatprep.mubr.msk.bf16.mxu0 %vm3378_vm0, %v3377_v0 }
0x1274   :  { %3048 = vmatmul.mubr.msk.bf16.vlgmr.msra.gmra.mrb[48].mxu1 %vm168_vm2, %v1589_v62  ;;  %3063 = vmatprep.subr.bf16.mxu0 %v3377_v0 }
0x1275   :  { %3058 = vmatpush3.bf16.xpose.msra.mxu1 %v1744_v1  ;;  %3059 = vmatprep.mubr.msk.bf16.mxu1 %vm3378_vm0, %v3377_v0 }
0x1276   :  { %3069 = vmatprep.subr.bf16.mxu1 %v3377_v0 }
0x127a   :  { %3054 = vmatmul.mubr.msk.bf16.vlgmr.msra.gmra.mrb[48].mxu0 %vm168_vm2, %v1687_v2 }
0x127b   :  { %3065 = vmatprep.mubr.msk.bf16.mxu0 %vm3378_vm0, %v3377_v0 }
0x127c   :  { %3060 = vmatmul.mubr.msk.bf16.vlgmr.msra.gmra.mrb[52].mxu1 %vm168_vm2, %v1737_v3 }
0x127d   :  { %3071 = vmatprep.mubr.msk.bf16.mxu1 %vm3378_vm0, %v3377_v0 }
0x1345   :  { %v3820_v4 = vpop.f32.mrb[44].mxu0 }
0x1346   :  { %v3043_v12 = vpop.f32.mrb[45].mxu0 }
0x1347   :  { %v1635_v46 = vpop.f32.mrb[46].mxu0  ;;  %v3822_v50 = vpop.f32.mrb[48].mxu1 }
0x1348   :  { %v3044_v51 = vpop.f32.mrb[47].mxu0  ;;  %v3049_v5 = vpop.f32.mrb[49].mxu1 }
0x1349   :  { %v1683_v6 = vpop.f32.mrb[50].mxu1 }
0x134a   :  { %v3050_v7 = vpop.f32.mrb[51].mxu1 }
0x134d   :  { %v1730_v10 = vpop.f32.mrb[48].mxu0 }
0x134e   :  { %v3055_v11 = vpop.f32.mrb[49].mxu0  ;;  %v1786_v13 = vsel %vm168_vm2, %v1730_v10, -inf }
0x134f   :  { %1787 = vmax.xlane.f32.xlu1 %v1786_v13  ;;  %v1733_v14 = vpop.f32.mrb[50].mxu0  ;;  %v1780_v16 = vpop.f32.mrb[52].mxu1 }
0x1350   :  { %v3056_v18 = vpop.f32.mrb[51].mxu0  ;;  %v3061_v20 = vpop.f32.mrb[53].mxu1  ;;  %v1789_v21 = vsel %vm168_vm2, %v1780_v16, -inf }
0x1351   :  { %1790 = vmax.xlane.f32.xlu0 %v1789_v21  ;;  %v1783_v23 = vpop.f32.mrb[54].mxu1 }
0x1352   :  { %v3062_v24 = vpop.f32.mrb[55].mxu1 }
0x1360   :  { %1858 = vrot.lane.b32.xlu1 %v3766_v22, %s3383_s19 }
0x1367   :  { %1810 = vrot.lane.b32.xlu0 %v3764_v19, %s3383_s19  ;;  %s2676_s19 = sshll.u32 %s3392_s18, 4  ;;  %s2677_s19 = int_to_ptr.vmem [resolvable:$true] %s2676_s19 }
0x1368   :  { %p3350_p3 = scmp.lt.s32.totalorder %s2677_s19, %s2677_s19 }
0x13dc   :  { %v1788_v25 = vpop.xlane.xlu1 %1787 }
0x13dd   :  { %v1792_v26 = vsub.f32 %v1730_v10, %v1788_v25 }
0x13de   :  { %v1791_v27 = vpop.xlane.xlu0 %1790 }
0x13df   :  { %v1794_v28 = vmul.f32 1.442695, %v1792_v26  ;;  %v1793_v29 = vsub.f32 %v1780_v16, %v1791_v27 }
0x13e0   :  { %v1859_v30 = vpop.permute.xlu1 %1858 }
0x13e1   :  { %3269 = vpow2.f32 %v1794_v28  ;;  %v1796_v31 = vmul.f32 1.442695, %v1793_v29  ;;  %v1864_v32 = vsel %vm292_vm3, %v1859_v30, 0 }
0x13e2   :  { %3070 = vmatpush3.bf16.msra.mxu1 %v1864_v32  ;;  %v1811_v33 = vpop.permute.xlu0 %1810 }
0x13e3   :  { %3271 = vpow2.f32 %v1796_v31  ;;  %v1816_v34 = vsel %vm292_vm3, %v1811_v33, 0  ;;  %3081 = vmatprep.subr.bf16.mxu1 %v3377_v0 }
0x13e4   :  { %3064 = vmatpush3.bf16.msra.mxu0 %v1816_v34 }
0x13e5   :  { %3075 = vmatprep.subr.bf16.mxu0 %v3377_v0 }
0x13eb   :  { %v3270_v35 = vpop.eup %3269 }
0x13ec   :  { %v1798_v36 = vsel %vm168_vm2, %v3270_v35, 0.0 }
0x13ed   :  { %v3272_v37 = vpop.eup %3271  ;;  %1799 = vadd.xlane.f32.xlu0 %v1798_v36 }
0x13ee   :  { %v1801_v38 = vsel %vm168_vm2, %v3272_v37, 0.0 }
0x13ef   :  { %1802 = vadd.xlane.f32.xlu1 %v1801_v38 }
0x1400   :  { %1908 = vrot.lane.b32.xlu1 %v3764_v19, %s3384_s20 }
0x1403   :  { %1958 = vrot.lane.b32.xlu0 %v3766_v22, %s3384_s20  ;;  %s4031_s20 = smov 24  }
0x1404   :  { %1906 = vrot.lane.b32.xlu1 %v3764_v19, %s3385_s21 }
0x1407   :  { %1956 = vrot.lane.b32.xlu0 %v3766_v22, %s3385_s21 }
0x147a   :  { %v1800_v39 = vpop.xlane.xlu0 %1799 }
0x147b   :  { %3273 = vrcp.f32 %v1800_v39 }
0x147c   :  { %v1803_v40 = vpop.xlane.xlu1 %1802 }
0x147d   :  { %3275 = vrcp.f32 %v1803_v40 }
0x147e   :  { %v1959_v59 = vpop.permute.xlu0 %1958 }
0x147f   :  { %v1964_v49 = vsel %vm168_vm2, %v1959_v59, 0 }
0x1480   :  { %v1909_v44 = vpop.permute.xlu1 %1908 }
0x1481   :  { %v1914_v47 = vsel %vm168_vm2, %v1909_v44, 0 }
0x1482   :  { %v1957_v53 = vpop.permute.xlu0 %1956 }
0x1484   :  { %v1907_v52 = vpop.permute.xlu1 %1906 }
0x1485   :  { %v3274_v41 = vpop.eup %3273 }
0x1486   :  { %v1806_v42 = vmul.f32 %v3274_v41, %v3270_v35 }
0x1487   :  { %v3276_v43 = vpop.eup %3275 }
0x1488   :  { %v1807_v63 = vmul.f32 %v3276_v43, %v3272_v37  ;;  %v1808_v45 = vpack.c.bf16 %v1806_v42, %v1806_v42 }
0x148a   :  { %3066 = vmatmul.mubr.msk.bf16.vlgmr.msra.gmra.mrb[52].mxu0 %vm168_vm2, %v1808_v45  ;;  %v1809_v48 = vpack.c.bf16 %v1807_v63, %v1807_v63 }
0x148b   :  { %3076 = vmatpush3.bf16.xpose.msra.mxu0 %v1914_v47  ;;  %3077 = vmatprep.mubr.msk.bf16.mxu0 %vm3378_vm0, %v3377_v0 }
0x148c   :  { %3072 = vmatmul.mubr.msk.bf16.vlgmr.msra.gmra.mrb[56].mxu1 %vm168_vm2, %v1809_v48  ;;  %3087 = vmatprep.subr.bf16.mxu0 %v3377_v0 }
0x148d   :  { %3082 = vmatpush3.bf16.xpose.msra.mxu1 %v1964_v49  ;;  %3083 = vmatprep.mubr.msk.bf16.mxu1 %vm3378_vm0, %v3377_v0 }
0x148e   :  { %3093 = vmatprep.subr.bf16.mxu1 %v3377_v0 }
0x1492   :  { %3078 = vmatmul.mubr.msk.bf16.vlgmr.msra.gmra.mrb[56].mxu0 %vm168_vm2, %v1907_v52 }
0x1493   :  { %3089 = vmatprep.mubr.msk.bf16.mxu0 %vm3378_vm0, %v3377_v0 }
0x1494   :  { %3084 = vmatmul.mubr.msk.bf16.vlgmr.msra.gmra.mrb[60].mxu1 %vm168_vm2, %v1957_v53 }
0x1495   :  { %3095 = vmatprep.mubr.msk.bf16.mxu1 %vm3378_vm0, %v3377_v0 }
0x155d   :  { %v3860_v54 = vpop.f32.mrb[52].mxu0 }
0x155e   :  { %v3067_v55 = vpop.f32.mrb[53].mxu0 }
0x155f   :  { %v1855_v56 = vpop.f32.mrb[54].mxu0  ;;  %v3862_v57 = vpop.f32.mrb[56].mxu1 }
0x1560   :  { %v3186_v8 = vpack.i.bf16 %v3862_v57, %v3860_v54  ;;  %v3068_v9 = vpop.f32.mrb[55].mxu0  ;;  %v3073_v58 = vpop.f32.mrb[57].mxu1 }
0x1561   :  { %v1903_v60 = vpop.f32.mrb[58].mxu1 }
0x1562   :  { %v3074_v61 = vpop.f32.mrb[59].mxu1 }
0x1565   :  { %v1950_v62 = vpop.f32.mrb[56].mxu0 }
0x1566   :  { %v3079_v1 = vpop.f32.mrb[57].mxu0  ;;  %v2006_v2 = vsel %vm168_vm2, %v1950_v62, -inf }
0x1567   :  { %2007 = vmax.xlane.f32.xlu1 %v2006_v2  ;;  %v1953_v3 = vpop.f32.mrb[58].mxu0  ;;  %v2000_v12 = vpop.f32.mrb[60].mxu1 }
0x1568   :  { %v3080_v46 = vpop.f32.mrb[59].mxu0  ;;  %v3085_v51 = vpop.f32.mrb[61].mxu1  ;;  %v2009_v5 = vsel %vm168_vm2, %v2000_v12, -inf }
0x1569   :  { %2010 = vmax.xlane.f32.xlu0 %v2009_v5  ;;  %v2003_v6 = vpop.f32.mrb[62].mxu1 }
0x156a   :  { %v3086_v7 = vpop.f32.mrb[63].mxu1 }
0x1578   :  { %2078 = vrot.lane.b32.xlu1 %v3766_v22, %s3386_s23 }
0x157f   :  { %2030 = vrot.lane.b32.xlu0 %v3764_v19, %s3386_s23 }
0x15f4   :  { %v2008_v10 = vpop.xlane.xlu1 %2007 }
0x15f5   :  { %v2012_v11 = vsub.f32 %v1950_v62, %v2008_v10 }
0x15f6   :  { %v2011_v13 = vpop.xlane.xlu0 %2010 }
0x15f7   :  { %v2014_v14 = vmul.f32 1.442695, %v2012_v11  ;;  %v2013_v16 = vsub.f32 %v2000_v12, %v2011_v13 }
0x15f8   :  { %v2079_v18 = vpop.permute.xlu1 %2078 }
0x15f9   :  { %3277 = vpow2.f32 %v2014_v14  ;;  %v2016_v20 = vmul.f32 1.442695, %v2013_v16  ;;  %v2084_v21 = vsel %vm292_vm3, %v2079_v18, 0 }
0x15fa   :  { %3094 = vmatpush3.bf16.msra.mxu1 %v2084_v21  ;;  %v2031_v23 = vpop.permute.xlu0 %2030 }
0x15fb   :  { %3279 = vpow2.f32 %v2016_v20  ;;  %v2036_v24 = vsel %vm292_vm3, %v2031_v23, 0  ;;  %3105 = vmatprep.subr.bf16.mxu1 %v3377_v0 }
0x15fc   :  { %3088 = vmatpush3.bf16.msra.mxu0 %v2036_v24 }
0x15fd   :  { %3099 = vmatprep.subr.bf16.mxu0 %v3377_v0 }
0x1603   :  { %v3278_v25 = vpop.eup %3277 }
0x1604   :  { %v2018_v26 = vsel %vm168_vm2, %v3278_v25, 0.0 }
0x1605   :  { %v3280_v27 = vpop.eup %3279  ;;  %2019 = vadd.xlane.f32.xlu0 %v2018_v26  ;;  %v3214_v26 = vld [vmem:[%s4017_s3 + $0x18] sm:$0xff]  }
0x1606   :  { %v2021_v28 = vsel %vm168_vm2, %v3280_v27, 0.0 }
0x1607   :  { %2022 = vadd.xlane.f32.xlu1 %v2021_v28 }
0x1618   :  { %2128 = vrot.lane.b32.xlu1 %v3764_v19, %s3387_s24 }
0x161b   :  { %2178 = vrot.lane.b32.xlu0 %v3766_v22, %s3387_s24 }
0x161c   :  { %2126 = vrot.lane.b32.xlu1 %v3764_v19, %s3388_s25 }
0x161f   :  { %2176 = vrot.lane.b32.xlu0 %v3766_v22, %s3388_s25 }
0x1692   :  { %v2020_v29 = vpop.xlane.xlu0 %2019 }
0x1693   :  { %3281 = vrcp.f32 %v2020_v29 }
0x1694   :  { %v2023_v30 = vpop.xlane.xlu1 %2022 }
0x1695   :  { %3283 = vrcp.f32 %v2023_v30 }
0x1696   :  { %v2179_v37 = vpop.permute.xlu0 %2178 }
0x1697   :  { %v2184_v40 = vsel %vm168_vm2, %v2179_v37, 0 }
0x1698   :  { %v2129_v34 = vpop.permute.xlu1 %2128 }
0x1699   :  { %v2134_v38 = vsel %vm168_vm2, %v2129_v34, 0 }
0x169a   :  { %v2177_v42 = vpop.permute.xlu0 %2176 }
0x169c   :  { %v2127_v41 = vpop.permute.xlu1 %2126 }
0x169d   :  { %v3282_v31 = vpop.eup %3281 }
0x169e   :  { %v2026_v32 = vmul.f32 %v3282_v31, %v3278_v25  ;;  %v3213_v25 = vld [vmem:[%s4017_s3 + $0x10] sm:$0xff]  }
0x169f   :  { %v3284_v33 = vpop.eup %3283 }
0x16a0   :  { %v2027_v35 = vmul.f32 %v3284_v33, %v3280_v27  ;;  %v2028_v36 = vpack.c.bf16 %v2026_v32, %v2026_v32 }
0x16a2   :  { %3090 = vmatmul.mubr.msk.bf16.vlgmr.msra.gmra.mrb[60].mxu0 %vm168_vm2, %v2028_v36  ;;  %v2029_v39 = vpack.c.bf16 %v2027_v35, %v2027_v35 }
0x16a3   :  { %3100 = vmatpush3.bf16.xpose.msra.mxu0 %v2134_v38  ;;  %3101 = vmatprep.mubr.msk.bf16.mxu0 %vm3378_vm0, %v3377_v0 }
0x16a4   :  { %3096 = vmatmul.mubr.msk.bf16.vlgmr.msra.gmra.mrb[64].mxu1 %vm168_vm2, %v2029_v39  ;;  %3111 = vmatprep.subr.bf16.mxu0 %v3377_v0 }
0x16a5   :  { %3106 = vmatpush3.bf16.xpose.msra.mxu1 %v2184_v40  ;;  %3107 = vmatprep.mubr.msk.bf16.mxu1 %vm3378_vm0, %v3377_v0 }
0x16a6   :  { %3117 = vmatprep.subr.bf16.mxu1 %v3377_v0 }
0x16aa   :  { %3102 = vmatmul.mubr.msk.bf16.vlgmr.msra.gmra.mrb[64].mxu0 %vm168_vm2, %v2127_v41 }
0x16ab   :  { %3113 = vmatprep.mubr.msk.bf16.mxu0 %vm3378_vm0, %v3377_v0 }
0x16ac   :  { %3108 = vmatmul.mubr.msk.bf16.vlgmr.msra.gmra.mrb[68].mxu1 %vm168_vm2, %v2177_v42 }
0x16ad   :  { %3119 = vmatprep.mubr.msk.bf16.mxu1 %vm3378_vm0, %v3377_v0 }
0x1775   :  { %v2072_v43 = vpop.f32.mrb[60].mxu0 }
0x1776   :  { %v3091_v44 = vpop.f32.mrb[61].mxu0 }
0x1777   :  { %v2075_v63 = vpop.f32.mrb[62].mxu0  ;;  %v2120_v45 = vpop.f32.mrb[64].mxu1 }
0x1778   :  { %v3191_v59 = vpack.i.bf16 %v2120_v45, %v2072_v43  ;;  %v3092_v47 = vpop.f32.mrb[63].mxu0  ;;  %v3097_v48 = vpop.f32.mrb[65].mxu1 }
0x1779   :  { %v2123_v49 = vpop.f32.mrb[66].mxu1 }
0x177a   :  { %v3098_v52 = vpop.f32.mrb[67].mxu1 }
0x177d   :  { %v2170_v53 = vpop.f32.mrb[64].mxu0 }
0x177e   :  { %v3103_v55 = vpop.f32.mrb[65].mxu0  ;;  %v2226_v56 = vsel %vm168_vm2, %v2170_v53, -inf }
0x177f   :  { %2227 = vmax.xlane.f32.xlu1 %v2226_v56  ;;  %v2173_v9 = vpop.f32.mrb[66].mxu0  ;;  %v2220_v58 = vpop.f32.mrb[68].mxu1 }
0x1780   :  { %v3104_v60 = vpop.f32.mrb[67].mxu0  ;;  %v3109_v61 = vpop.f32.mrb[69].mxu1  ;;  %v2229_v62 = vsel %vm168_vm2, %v2220_v58, -inf }
0x1781   :  { %2230 = vmax.xlane.f32.xlu0 %v2229_v62  ;;  %v2223_v1 = vpop.f32.mrb[70].mxu1 }
0x1782   :  { %v3110_v2 = vpop.f32.mrb[71].mxu1 }
0x180c   :  { %v2228_v3 = vpop.xlane.xlu1 %2227 }
0x180d   :  { %v2232_v12 = vsub.f32 %v2170_v53, %v2228_v3  ;;  %v3217_v3 = vld [vmem:[%s4022_s8 + $0x20] sm:$0xff]  }
0x180e   :  { %v2231_v46 = vpop.xlane.xlu0 %2230 }
0x180f   :  { %v2234_v51 = vmul.f32 1.442695, %v2232_v12  ;;  %v2233_v5 = vsub.f32 %v2220_v58, %v2231_v46  ;;  %v3218_v12 = vld [vmem:[%s4022_s8 + $0x28] sm:$0xff]  }
0x1811   :  { %3285 = vpow2.f32 %v2234_v51  ;;  %v2236_v6 = vmul.f32 1.442695, %v2233_v5 }
0x1813   :  { %3287 = vpow2.f32 %v2236_v6 }
0x181b   :  { %v3286_v7 = vpop.eup %3285 }
0x181c   :  { %v2238_v10 = vsel %vm168_vm2, %v3286_v7, 0.0 }
0x181d   :  { %v3288_v11 = vpop.eup %3287  ;;  %2239 = vadd.xlane.f32.xlu0 %v2238_v10 }
0x181e   :  { %v2241_v13 = vsel %vm168_vm2, %v3288_v11, 0.0 }
0x181f   :  { %2242 = vadd.xlane.f32.xlu1 %v2241_v13 }
0x1830   :  { %2298 = vrot.lane.b32.xlu1 %v3766_v22, %s3389_s26 }
0x1833   :  { %2250 = vrot.lane.b32.xlu0 %v3764_v19, %s3389_s26 }
0x1834   :  { %3187 = vrot.lane.b32.xlu1 %v3186_v8, %s3375_s14 }
0x1837   :  { %3192 = vrot.lane.b32.xlu0 %v3191_v59, %s4030_s15 }
0x18aa   :  { %v2240_v14 = vpop.xlane.xlu0 %2239 }
0x18ab   :  { %3289 = vrcp.f32 %v2240_v14 }
0x18ac   :  { %v2243_v16 = vpop.xlane.xlu1 %2242 }
0x18ad   :  { %3291 = vrcp.f32 %v2243_v16 }
0x18ae   :  { %v2251_v18 = vpop.permute.xlu0 %2250 }
0x18af   :  { %v2256_v20 = vsel %vm292_vm3, %v2251_v18, 0 }
0x18b0   :  { %v2299_v21 = vpop.permute.xlu1 %2298  ;;  %3112 = vmatpush3.bf16.msra.mxu0 %v2256_v20 }
0x18b1   :  { %v2304_v22 = vsel %vm292_vm3, %v2299_v21, 0  ;;  %3123 = vmatprep.subr.bf16.mxu0 %v3377_v0 }
0x18b2   :  { %3118 = vmatpush3.bf16.msra.mxu1 %v2304_v22  ;;  %v3193_v39 = vpop.permute.xlu0 %3192 }
0x18b3   :  { %3131 = vmatprep.subr.bf16.mxu1 %v3377_v0  ;;  %v3195_v42 = vunpack.i.h.bf16 %v3193_v39  ;;  %v3194_v43 = vunpack.i.l.bf16 %v3193_v39 }
0x18b4   :  { %v3188_v36 = vpop.permute.xlu1 %3187 }
0x18b5   :  { %v3290_v19 = vpop.eup %3289  ;;  %v3190_v37 = vunpack.i.h.bf16 %v3188_v36  ;;  %v3189_v38 = vunpack.i.l.bf16 %v3188_v36 }
0x18b6   :  { %v2246_v54 = vmul.f32 %v3290_v19, %v3286_v7 }
0x18b7   :  { %v3292_v57 = vpop.eup %3291  ;;  %v2371_v40 = vsel %vm168_vm2, %v3822_v50, %v3190_v37  ;;  %v2370_v41 = vsel %vm168_vm2, %v3820_v4, %v3189_v38 }
0x18b8   :  { %v2247_v8 = vmul.f32 %v3292_v57, %v3288_v11  ;;  %v2248_v23 = vpack.c.bf16 %v2246_v54, %v2246_v54  ;;  %v2372_v59 = vsel %vm1070_vm4, %v2370_v41, %v3194_v43  ;;  %v2373_v47 = vsel %vm1070_vm4, %v2371_v40, %v3195_v42 }
0x18ba   :  { %3114 = vmatmul.mubr.msk.bf16.vlgmr.msra.gmra.mrb[68].mxu0 %vm168_vm2, %v2248_v23  ;;  %v2249_v24 = vpack.c.bf16 %v2247_v8, %v2247_v8  ;;  %v2777_v8 = vld [vmem:[%s4018_s4 + $0x1] ss:$0 sm:$0xff] }
0x18bb   :  { %3127 = vmatprep.mubr.msk.bf16.mxu0 %vm3378_vm0, %v3377_v0  ;;  %3124 = vmatpush3.bf16.msra.mxu0 %v3213_v25 }
0x18bc   :  { %3120 = vmatmul.mubr.msk.bf16.vlgmr.msra.gmra.mrb[72].mxu1 %vm168_vm2, %v2249_v24  ;;  %3125 = vmatprep.subr.bf16.mxu0 %v3377_v0 }
0x18bd   :  { %3135 = vmatprep.mubr.msk.bf16.mxu1 %vm3378_vm0, %v3377_v0 }
0x18bf   :  { %3126 = vmatpush3.bf16.msra.mxu0 %v3214_v26 }
0x18c0   :  { %3139 = vmatprep.subr.bf16.mxu0 %v3377_v0 }
0x198d   :  { %v2292_v27 = vpop.f32.mrb[68].mxu0 }
0x198e   :  { %v3115_v28 = vpop.f32.mrb[69].mxu0 }
0x198f   :  { %v2295_v29 = vpop.f32.mrb[70].mxu0  ;;  %v2340_v30 = vpop.f32.mrb[72].mxu1 }
0x1990   :  { %v3196_v31 = vpack.i.bf16 %v2340_v30, %v2292_v27  ;;  %v3116_v32 = vpop.f32.mrb[71].mxu0  ;;  %v3121_v33 = vpop.f32.mrb[73].mxu1  ;;  %v2778_v27 = vld [vmem:[%s4019_s5 + $0x1] ss:$0 sm:$0xff] }
0x1991   :  { %v2343_v34 = vpop.f32.mrb[74].mxu1  ;;  %v3219_v32 = vld [vmem:[%s4022_s8 + $0x30] sm:$0xff]   ;;  %v3220_v33 = vld [vmem:[%s4022_s8 + $0x38] sm:$0xff]  }
0x1992   :  { %3197 = vrot.lane.b32.xlu1 %v3196_v31, %s4031_s20  ;;  %v3122_v35 = vpop.f32.mrb[75].mxu1  ;;  %v2779_v34 = vld [vmem:[%s4021_s7 + $0x1] ss:$0 sm:$0xff] }
0x1a04   :  { %v3198_v44 = vpop.permute.xlu1 %3197 }
0x1a05   :  { %v3200_v63 = vunpack.i.h.bf16 %v3198_v44  ;;  %v3199_v45 = vunpack.i.l.bf16 %v3198_v44 }
0x1a07   :  { %v2375_v48 = vsel %vm1073_vm5, %v2373_v47, %v3200_v63  ;;  %v2374_v49 = vsel %vm1073_vm5, %v2372_v59, %v3199_v45 }
0x1a08   :  { %v2376_v52 = vpack.c.bf16 %v2375_v48, %v2374_v49 }
0x1a0a   :  { %3128 = vmatmul.mubr.msk.bf16.vlgmr.msra.gmra.mrb[72].mxu0 %vm115_vm1, %v2376_v52 }
0x1a0b   :  { %3147 = vmatprep.mubr.msk.bf16.mxu0 %vm3378_vm0, %v3377_v0  ;;  %3140 = vmatpush3.bf16.msra.mxu0 %v3217_v3 }
0x1a0c   :  { %3141 = vmatprep.subr.bf16.mxu0 %v3377_v0 }
0x1a0f   :  { %3142 = vmatpush3.bf16.msra.mxu0 %v3218_v12 }
0x1a10   :  { %3143 = vmatprep.subr.bf16.mxu0 %v3377_v0 }
0x1a13   :  { %3144 = vmatpush3.bf16.msra.mxu0 %v3219_v32 }
0x1a14   :  { %3145 = vmatprep.subr.bf16.mxu0 %v3377_v0 }
0x1a17   :  { %3146 = vmatpush3.bf16.msra.mxu0 %v3220_v33 }
0x1add   :  { %v2426_v4 = vpop.f32.mrb[72].mxu0 }
0x1ade   :  { %v2433_v50 = vadd.f32 %v2426_v4, %v3755_v15  ;;  %v3129_v53 = vpop.f32.mrb[73].mxu0  ;;  %v3215_v15 = vld [vmem:[%s4020_s6 + $0x10] sm:$0xff]  }
0x1adf   :  { %v2429_v55 = vpop.f32.mrb[74].mxu0  ;;  %3132 = vmatpush3.bf16.msra.mxu1 %v3215_v15 }
0x1ae0   :  { %v2434_v56 = vadd.f32 %v2429_v55, %v3757_v17  ;;  %v3130_v9 = vpop.f32.mrb[75].mxu0  ;;  %v2435_v58 = vsel %vm115_vm1, %v2433_v50, 0.0  ;;  %v2443_v60 = vmul.f32 %v2433_v50, %v2433_v50  ;;  %v3216_v17 = vld [vmem:[%s4020_s6 + $0x18] sm:$0xff]   ;;  %3133 = vmatprep.subr.bf16.mxu1 %v3377_v0  ;;  %v2783_v0 = vld [vmem:[%s4023_s9 + $0x1] ss:$0 sm:$0xff] }
0x1ae1   :  { %2436 = vadd.xlane.f32.xlu0 %v2435_v58 }
0x1ae2   :  { %v2438_v61 = vsel %vm115_vm1, %v2434_v56, 0.0  ;;  %v2445_v62 = vsel %vm115_vm1, %v2443_v60, 0.0  ;;  %v2444_v1 = vmul.f32 %v2434_v56, %v2434_v56 }
0x1ae3   :  { %2439 = vadd.xlane.f32.xlu1 %v2438_v61  ;;  %3134 = vmatpush3.bf16.msra.mxu1 %v3216_v17 }
0x1ae4   :  { %v2448_v2 = vsel %vm115_vm1, %v2444_v1, 0.0 }
0x1ae5   :  { %2446 = vadd.xlane.f32.xlu0 %v2445_v62 }
0x1ae9   :  { %2449 = vadd.xlane.f32.xlu0 %v2448_v2 }
0x1b6e   :  { %v2437_v46 = vpop.xlane.xlu0 %2436 }
0x1b6f   :  { %v2441_v51 = vmul.f32 0.03125, %v2437_v46 }
0x1b70   :  { %v2440_v5 = vpop.xlane.xlu1 %2439 }
0x1b71   :  { %v2453_v7 = vmul.f32 %v2441_v51, %v2441_v51  ;;  %v2442_v10 = vmul.f32 0.03125, %v2440_v5  ;;  %v2457_v19 = vsub.f32 %v2433_v50, %v2441_v51 }
0x1b72   :  { %v2447_v6 = vpop.xlane.xlu0 %2446 }
0x1b73   :  { %v2451_v11 = vmul.f32 0.03125, %v2447_v6  ;;  %v2454_v16 = vmul.f32 %v2442_v10, %v2442_v10  ;;  %v2458_v23 = vsub.f32 %v2434_v56, %v2442_v10 }
0x1b75   :  { %v2455_v13 = vsub.f32 %v2451_v11, %v2453_v7  ;;  %v2789_v11 = vld [vmem:[%s4024_s10 + $0x1] ss:$0 sm:$0xff]  ;;  %s3345_s10 = scalar_lea.vmem %s2677_s19, 256 }
0x1b76   :  { %v2450_v14 = vpop.xlane.xlu0 %2449  ;;  %p3346_p2 = scmp.ne.s32.totalorder %s2677_s19, %s3345_s10  ;;  %p3351_p4 = scmp.lt.s32.totalorder %s3345_s10, %s3345_s10 }
0x1b77   :  { %v2459_v18 = vadd.f32 1e-05, %v2455_v13  ;;  %v2452_v20 = vmul.f32 0.03125, %v2450_v14 }
0x1b78   :  { %p3352_p5 = por %p3351_p4, %p3350_p3 }
0x1b79   :  { %3293 = vrsqrt.f32 %v2459_v18  ;;  %v2456_v21 = vsub.f32 %v2452_v20, %v2454_v16  ;;  %v2790_v18 = vld [vmem:[%s4025_s11 + $0x1] ss:$0 sm:$0xff] }
0x1b7a   :  { %p3353_p6 = pnand %p3352_p5, %p3346_p2 }
0x1b7b   :  { %v2460_v22 = vadd.f32 1e-05, %v2456_v21 }
0x1b7d   :  { %3295 = vrsqrt.f32 %v2460_v22 }
0x1b83   :  { %v3294_v54 = vpop.eup %3293 }
0x1b84   :  { %v2463_v57 = vmul.f32 %v3294_v54, %v2457_v19 }
0x1b86   :  { %v2471_v26 = vmul.f32 %v2777_v8, %v2463_v57 }
0x1b87   :  { %v3296_v24 = vpop.eup %3295 }
0x1b88   :  { %v2464_v25 = vmul.f32 %v3296_v24, %v2458_v23  ;;  %v2479_v29 = vadd.f32 %v2778_v27, %v2471_v26 }
0x1b8a   :  { %v2472_v28 = vmul.f32 %v2777_v8, %v2464_v25 }
0x1b8c   :  { %v2480_v30 = vadd.f32 %v2778_v27, %v2472_v28 }
0x1b8e   :  { %v2481_v31 = vpack.c.bf16 %v2480_v30, %v2479_v29 }
0x1b90   :  { %3136 = vmatmul.mubr.msk.bf16.vlgmr.msra.gmra.mrb[76].mxu1 %vm115_vm1, %v2481_v31 }
0x1c63   :  { %v2537_v35 = vpop.f32.mrb[76].mxu1 }
0x1c64   :  { %v2538_v36 = vadd.f32 %v2779_v34, %v2537_v35  ;;  %v3137_v37 = vpop.f32.mrb[77].mxu1 }
0x1c65   :  { %v2540_v38 = vpop.f32.mrb[78].mxu1 }
0x1c66   :  { %v2541_v39 = vadd.f32 %v2779_v34, %v2540_v38  ;;  %v3138_v40 = vpop.f32.mrb[79].mxu1  ;;  %v2544_v41 = vmax.f32 %v2538_v36, 0.0 }
0x1c68   :  { %v2545_v42 = vmax.f32 %v2541_v39, 0.0 }
0x1c6a   :  { %v2546_v43 = vpack.c.bf16 %v2545_v42, %v2544_v41 }
0x1c6c   :  { %3148 = vmatmul.mubr.msk.bf16.vlgmr.msra.gmra.mrb[76].mxu0 %vm1278_vm6, %v2546_v43 }
0x1d3f   :  { %v2614_v44 = vpop.f32.mrb[76].mxu0 }
0x1d40   :  { %v2615_v63 = vadd.f32 %v2783_v0, %v2614_v44  ;;  %v3149_v45 = vpop.f32.mrb[77].mxu0 }
0x1d41   :  { %v2617_v59 = vpop.f32.mrb[78].mxu0 }
0x1d42   :  { %v2621_v47 = vadd.f32 %v2615_v63, %v2479_v29  ;;  %v2618_v48 = vadd.f32 %v2783_v0, %v2617_v59  ;;  %v3150_v49 = vpop.f32.mrb[79].mxu0 }
0x1d44   :  { %v2622_v52 = vadd.f32 %v2618_v48, %v2480_v30  ;;  %v2623_v4 = vsel %vm115_vm1, %v2621_v47, 0.0  ;;  %v2631_v50 = vmul.f32 %v2621_v47, %v2621_v47 }
0x1d45   :  { %2624 = vadd.xlane.f32.xlu1 %v2623_v4 }
0x1d46   :  { %v2626_v53 = vsel %vm115_vm1, %v2622_v52, 0.0  ;;  %v2632_v55 = vmul.f32 %v2622_v52, %v2622_v52  ;;  %v2633_v56 = vsel %vm115_vm1, %v2631_v50, 0.0 }
0x1d47   :  { %2627 = vadd.xlane.f32.xlu0 %v2626_v53 }
0x1d48   :  { %v2636_v9 = vsel %vm115_vm1, %v2632_v55, 0.0 }
0x1d49   :  { %2634 = vadd.xlane.f32.xlu1 %v2633_v56 }
0x1d4b   :  { %2637 = vadd.xlane.f32.xlu0 %v2636_v9 }
0x1dd2   :  { %v2625_v58 = vpop.xlane.xlu1 %2624 }
0x1dd3   :  { %v2629_v60 = vmul.f32 0.03125, %v2625_v58 }
0x1dd4   :  { %v2628_v61 = vpop.xlane.xlu0 %2627 }
0x1dd5   :  { %v2630_v62 = vmul.f32 0.03125, %v2628_v61  ;;  %v2641_v2 = vmul.f32 %v2629_v60, %v2629_v60  ;;  %v2645_v7 = vsub.f32 %v2621_v47, %v2629_v60 }
0x1dd6   :  { %v2635_v1 = vpop.xlane.xlu1 %2634 }
0x1dd7   :  { %v2639_v15 = vmul.f32 0.03125, %v2635_v1  ;;  %v2642_v3 = vmul.f32 %v2630_v62, %v2630_v62  ;;  %v2646_v13 = vsub.f32 %v2622_v52, %v2630_v62 }
0x1dd8   :  { %v2638_v17 = vpop.xlane.xlu0 %2637 }
0x1dd9   :  { %v2643_v12 = vsub.f32 %v2639_v15, %v2641_v2  ;;  %v2640_v46 = vmul.f32 0.03125, %v2638_v17 }
0x1ddb   :  { %v2647_v51 = vadd.f32 1e-05, %v2643_v12  ;;  %v2644_v5 = vsub.f32 %v2640_v46, %v2642_v3 }
0x1ddd   :  { %3297 = vrsqrt.f32 %v2647_v51  ;;  %v2648_v6 = vadd.f32 1e-05, %v2644_v5 }
0x1ddf   :  { %3299 = vrsqrt.f32 %v2648_v6 }
0x1de7   :  { %v3298_v10 = vpop.eup %3297 }
0x1de8   :  { %v2651_v14 = vmul.f32 %v3298_v10, %v2645_v7 }
0x1de9   :  { %v3300_v16 = vpop.eup %3299 }
0x1dea   :  { %v2652_v20 = vmul.f32 %v3300_v16, %v2646_v13  ;;  %v2659_v21 = vmul.f32 %v2789_v11, %v2651_v14 }
0x1dec   :  { %v2660_v22 = vmul.f32 %v2789_v11, %v2652_v20  ;;  %v2667_v19 = vadd.f32 %v2790_v18, %v2659_v21 }
0x1dee   :  { %v2668_v54 = vadd.f32 %v2790_v18, %v2660_v22  ;;  %2669 = vst.msk [vmem:[#allocation7] sm:$0xff] %vm115_vm1, %v2667_v19 }
0x1df0   :  { %2670 = vst.msk [vmem:[#allocation7 + $0x8] sm:$0xff] %vm115_vm1, %v2668_v54 }
0x1df1   :  { %3356 = shalt.err (!%p3353_p6)
}
0x1df2   :  { %s3357_s3 = scalar_lea.hbm %s4026_s12, 256 }
0x1df3   :  { %p3358_p7 = scmp.ne.s32.totalorder %s4026_s12, %s3357_s3  ;;  %p3361_p8 = scmp.lt.u32.totalorder %s3357_s3, %s4026_s12 }
0x1df5   :  { %p3363_p9 = pnand %p3361_p8, %p3358_p7 }
0x1df7   :  { %3366 = shalt.err (!%p3363_p9)
}
0x1df8   :  { %s4032_s26 = smov 128  }
0x1df9   :  { %2682 = dma.vmem_to_hbm [thread:$0]  %s2677_s19, 256, %s4026_s12, [#allocation4], %s4032_s26, %s4032_s26, %s3375_s14  }
0x1dfa   :  { %3371 = dma.done.wait [#allocation4], 256  }
0x1dfb   :  { %3372 = vsyncadd [#allocation4], 4294967040 }
0x1dfc   :  { %2686 = vsyncpa [#allocation3], 1 }
0x1dfd   :  { %2687 = vsyncpa [#allocation6], 1 }
0x1dfe   :  { %2688 = vsyncpa [#allocation4], 1 }

</bundles_post_ra>
